<compile_context>
chip_gen: v5e
topology: v5e:2x2
jax: 0.10.0
libtpu: 0.0.40
codegen_flags: <defaults>
</compile_context>

<pallas_src>
import functools

import jax
import jax.numpy as jnp
from jax import lax
from jax.experimental import pallas as pl
from jax.experimental.pallas import tpu as pltpu


# ----------------------------- Pallas kernel -------------------------------

def _meta_fused_kernel(xp_ref, par_ref, o_ref, *,
                       N, H, W, Hp, Wp, Cpad, Cout, K, LA):
    """Fused 3x3 conv + bias + ReLU + global-avg-pool + FC, whole batch.

    xp_ref  : (Cpad, Le) f32  zero-padded input, lane = n*Hp*Wp + h*Wp + w,
              zeros in padded channels / spatial border / lane tail.
    par_ref : (Cout, 9*Cpad + 1 + 2*K) f32 packed params
              [:, :9*Cpad]              conv weights, tap-major then channel
              [:, 9*Cpad]               conv bias
              [:, 9*Cpad+1 : +K]        fc weight (Cout, K)
              [0, 9*Cpad+1+K : +2K]     fc bias
    o_ref   : (N, K) logits
    """
    HWp = Hp * Wp
    C9 = 9 * Cpad

    par = par_ref[...]
    wc = par[:, :C9]                                    # (Cout, 9*Cpad)
    bc = par[:, C9:C9 + 1]                              # (Cout, 1)
    wf = par[:, C9 + 1:C9 + 1 + K]                      # (Cout, K)
    bf = par[0:1, C9 + 1 + K:C9 + 1 + 2 * K]            # (1, K)

    xp = xp_ref[...]                                    # (Cpad, Le)

    # 3x3 conv as 9 accumulated shifted-slice MXU matmuls (in-kernel im2col).
    # Output lane p = n*Hp*Wp + h*Wp + w holds the result for pixel (h, w) of
    # image n; tap (dh, dw) reads the same slab shifted by s = dh*Wp + dw.
    acc = jnp.zeros((Cout, LA), jnp.float32)
    for dh in range(3):
        for dw in range(3):
            t = dh * 3 + dw
            s = dh * Wp + dw                            # static lane shift
            x_s = xp[:, s:s + LA]                       # (Cpad, LA)
            acc = acc + jnp.dot(wc[:, t * Cpad:(t + 1) * Cpad], x_s,
                                preferred_element_type=jnp.float32)
    act = jnp.maximum(acc + bc, 0.0)                    # (Cout, LA), ReLU

    # Global average pooling mask built in-kernel from iota (no DMA'd pool
    # matrix).  Column n selects image n's H*W interior lanes, scaled by 1/HW.
    # Division-free decode: image id via range compare, (h, w) via exact
    # float reciprocal-multiply + floor (safe: |values| << 2^24, margin 0.5).
    lane = lax.broadcasted_iota(jnp.int32, (LA, N), 0)
    col = lax.broadcasted_iota(jnp.int32, (LA, N), 1)
    rem = lane - col * HWp                              # offset within image `col`
    in_img = (rem >= 0) & (rem < HWp)
    rem_f = rem.astype(jnp.float32)
    h = jnp.floor((rem_f + 0.5) * (1.0 / Wp))           # padded-image row
    w = rem_f - h * Wp                                  # padded-image col
    valid = in_img & (h < H) & (w < W)
    pool = valid.astype(jnp.float32) * (1.0 / (H * W))  # (LA, N)

    pooled = jnp.dot(act, pool, preferred_element_type=jnp.float32)   # (Cout, N)

    # Batched FC, contracting the Cout axis: (Cout, N) x (Cout, K) -> (N, K)
    logits = lax.dot_general(
        pooled, wf,
        dimension_numbers=(((0,), (0,)), ((), ())),
        preferred_element_type=jnp.float32) + bf
    # TODO(synk): emit lane-dense (K, N) / K-padded logits if N ever grows;
    # at (2, 5) the masked partial store is negligible.
    o_ref[...] = logits.astype(o_ref.dtype)


# ----------------------------- wrapper --------------------------------------

def meta_test_parallel_forward(x_nchw, conv_w, conv_b, fc_w, fc_b):
    """Forward of MetaTestParallel(inner_module) on a single device.

    scatter(inputs, kwargs, device_ids) with a single device id is an identity,
    so this is exactly `self.module(x)` for the wrapped classifier.

    x_nchw : (N, Cin, H, W)  float32
    conv_w : (Cout, Cin, 3, 3) torch OIHW layout
    conv_b : (Cout,)
    fc_w   : (K, Cout) torch layout
    fc_b   : (K,)
    returns logits (N, K) float32
    """
    N, Cin, H, W = x_nchw.shape
    Cout = conv_w.shape[0]
    K = fc_w.shape[0]
    Hp, Wp = H + 2, W + 2
    Cpad = ((Cin + 7) // 8) * 8                 # pad channels -> aligned matmul K
    L = N * Hp * Wp                             # flattened padded lanes
    max_valid = (N - 1) * Hp * Wp + (H - 1) * Wp + (W - 1)
    max_shift = 2 * Wp + 2
    LA = ((max_valid + 1 + 127) // 128) * 128   # activation / pool lane width
    Le = ((max(LA + max_shift, L) + 127) // 128) * 128   # input slab lane width

    # channel-major, spatially zero-padded, flattened, lane-padded input slab
    x_cmaj = jnp.transpose(x_nchw, (1, 0, 2, 3)).astype(jnp.float32)  # (Cin,N,H,W)
    x_pad = jnp.pad(x_cmaj, ((0, Cpad - Cin), (0, 0), (1, 1), (1, 1)))
    xp = x_pad.reshape(Cpad, L)
    xp = jnp.pad(xp, ((0, 0), (0, Le - L)))                           # (Cpad, Le)

    # pack every parameter into one (Cout, P) slab (single input DMA)
    wc = jnp.transpose(conv_w, (0, 2, 3, 1))                          # (Cout,3,3,Cin)
    wc = jnp.pad(wc, ((0, 0), (0, 0), (0, 0), (0, Cpad - Cin)))
    wc = wc.reshape(Cout, 9 * Cpad)
    bf_rows = jnp.zeros((Cout, K), jnp.float32).at[0, :].set(fc_b)
    params = jnp.concatenate(
        [wc, conv_b[:, None], jnp.transpose(fc_w), bf_rows],
        axis=1).astype(jnp.float32)                                   # (Cout, 9*Cpad+1+2K)

    kernel = functools.partial(
        _meta_fused_kernel, N=N, H=H, W=W, Hp=Hp, Wp=Wp,
        Cpad=Cpad, Cout=Cout, K=K, LA=LA)

    # TODO(synk): for large N*H*W add a lane-axis grid (parallel semantics,
    # tiles holding whole images) so v7x's two TensorCores split the batch and
    # the per-step working set stays inside v5e's 16 MiB scoped VMEM.
    # TODO(synk): at larger N cast xp/wc to bfloat16 for the conv matmul on
    # v6e/v7x (keep f32 accumulation via preferred_element_type).
    return pl.pallas_call(
        kernel,
        out_shape=jax.ShapeDtypeStruct((N, K), jnp.float32),
        in_specs=[pl.BlockSpec(memory_space=pltpu.MemorySpace.VMEM),
                  pl.BlockSpec(memory_space=pltpu.MemorySpace.VMEM)],
        out_specs=pl.BlockSpec(memory_space=pltpu.MemorySpace.VMEM),
    )(xp, params)


# ----------------------------- reference (plain JAX) ------------------------

def _reference_forward(x_nchw, conv_w, conv_b, fc_w, fc_b):
    conv = lax.conv_general_dilated(
        x_nchw, conv_w, window_strides=(1, 1), padding="SAME",
        dimension_numbers=("NCHW", "OIHW", "NCHW"))
    conv = conv + conv_b.reshape(1, -1, 1, 1)
    act = jnp.maximum(conv, 0.0)
    pooled = jnp.mean(act, axis=(2, 3))                          # (N, Cout)
    return pooled @ fc_w.T + fc_b


# ----------------------------- main ------------------------------------------

if __name__ == "__main__":
    # TODO(synk): MetaTestParallel's DataContainer scatter and the
    # before_meta_test/before_forward_* hooks are host-side control flow with
    # no tensor compute; only the wrapped module's forward maps to a kernel.
    key = jax.random.PRNGKey(0)
    k_x, k_cw, k_cb, k_fw, k_fb = jax.random.split(key, 5)

    N, Cin, H, W = 2, 4, 16, 16
    Cout, K = 8, 5

    x = jax.random.normal(k_x, (N, Cin, H, W), dtype=jnp.float32)
    conv_w = 0.1 * jax.random.normal(k_cw, (Cout, Cin, 3, 3), dtype=jnp.float32)
    conv_b = 0.1 * jax.random.normal(k_cb, (Cout,), dtype=jnp.float32)
    fc_w = 0.1 * jax.random.normal(k_fw, (K, Cout), dtype=jnp.float32)
    fc_b = 0.1 * jax.random.normal(k_fb, (K,), dtype=jnp.float32)

    fwd = jax.jit(meta_test_parallel_forward)
    out = jax.block_until_ready(fwd(x, conv_w, conv_b, fc_w, fc_b))

    ref = _reference_forward(x, conv_w, conv_b, fc_w, fc_b)
    assert out.shape == (N, K)
    assert jnp.allclose(out, ref, rtol=1e-4, atol=1e-4), (out, ref)

    print("KERNEL_OK")
</pallas_src>

<mosaic_0001>
module attributes {stable_mosaic.version = 11 : i64} {
  func.func @_meta_fused_kernel(%arg0: memref<8x768xf32, #tpu.memory_space<vmem>>, %arg1: memref<8x83xf32, #tpu.memory_space<vmem>>, %arg2: memref<2x5xf32, #tpu.memory_space<vmem>>) attributes {dimension_semantics = [], scalar_prefetch = 0 : i64, scratch_operands = 0 : i64, tpu.core_type = #tpu.core_type<tc>} {
    %c0 = arith.constant 0 : index
    %c0_0 = arith.constant 0 : index
    %0 = vector.load %arg1[%c0, %c0_0] : memref<8x83xf32, #tpu.memory_space<vmem>>, vector<8x83xf32>
    %1 = vector.extract_strided_slice %0 {offsets = [0, 0], sizes = [8, 72], strides = [1, 1]} : vector<8x83xf32> to vector<8x72xf32>
    %2 = vector.extract_strided_slice %0 {offsets = [0, 72], sizes = [8, 1], strides = [1, 1]} : vector<8x83xf32> to vector<8x1xf32>
    %3 = vector.extract_strided_slice %0 {offsets = [0, 73], sizes = [8, 5], strides = [1, 1]} : vector<8x83xf32> to vector<8x5xf32>
    %4 = vector.extract_strided_slice %0 {offsets = [0, 78], sizes = [1, 5], strides = [1, 1]} : vector<8x83xf32> to vector<1x5xf32>
    %c0_1 = arith.constant 0 : index
    %c0_2 = arith.constant 0 : index
    %5 = vector.load %arg0[%c0_1, %c0_2] : memref<8x768xf32, #tpu.memory_space<vmem>>, vector<8x768xf32>
    %cst = arith.constant 0.000000e+00 : f32
    %6 = vector.broadcast %cst : f32 to vector<8x640xf32>
    %7 = vector.extract_strided_slice %5 {offsets = [0, 0], sizes = [8, 640], strides = [1, 1]} : vector<8x768xf32> to vector<8x640xf32>
    %8 = vector.extract_strided_slice %1 {offsets = [0, 0], sizes = [8, 8], strides = [1, 1]} : vector<8x72xf32> to vector<8x8xf32>
    %cst_3 = arith.constant dense<0.000000e+00> : vector<8x640xf32>
    %9 = tpu.matmul %8, %7, %cst_3 {dimension_numbers = #tpu.dot_dimension_numbers<[1], [0], [0], [1], [0, 0, 1, 1], [], []>} : vector<8x8xf32>, vector<8x640xf32>, vector<8x640xf32> -> vector<8x640xf32>
    %10 = arith.addf %6, %9 : vector<8x640xf32>
    %11 = vector.extract_strided_slice %5 {offsets = [0, 1], sizes = [8, 640], strides = [1, 1]} : vector<8x768xf32> to vector<8x640xf32>
    %12 = vector.extract_strided_slice %1 {offsets = [0, 8], sizes = [8, 8], strides = [1, 1]} : vector<8x72xf32> to vector<8x8xf32>
    %cst_4 = arith.constant dense<0.000000e+00> : vector<8x640xf32>
    %13 = tpu.matmul %12, %11, %cst_4 {dimension_numbers = #tpu.dot_dimension_numbers<[1], [0], [0], [1], [0, 0, 1, 1], [], []>} : vector<8x8xf32>, vector<8x640xf32>, vector<8x640xf32> -> vector<8x640xf32>
    %14 = arith.addf %10, %13 : vector<8x640xf32>
    %15 = vector.extract_strided_slice %5 {offsets = [0, 2], sizes = [8, 640], strides = [1, 1]} : vector<8x768xf32> to vector<8x640xf32>
    %16 = vector.extract_strided_slice %1 {offsets = [0, 16], sizes = [8, 8], strides = [1, 1]} : vector<8x72xf32> to vector<8x8xf32>
    %cst_5 = arith.constant dense<0.000000e+00> : vector<8x640xf32>
    %17 = tpu.matmul %16, %15, %cst_5 {dimension_numbers = #tpu.dot_dimension_numbers<[1], [0], [0], [1], [0, 0, 1, 1], [], []>} : vector<8x8xf32>, vector<8x640xf32>, vector<8x640xf32> -> vector<8x640xf32>
    %18 = arith.addf %14, %17 : vector<8x640xf32>
    %19 = vector.extract_strided_slice %5 {offsets = [0, 18], sizes = [8, 640], strides = [1, 1]} : vector<8x768xf32> to vector<8x640xf32>
    %20 = vector.extract_strided_slice %1 {offsets = [0, 24], sizes = [8, 8], strides = [1, 1]} : vector<8x72xf32> to vector<8x8xf32>
    %cst_6 = arith.constant dense<0.000000e+00> : vector<8x640xf32>
    %21 = tpu.matmul %20, %19, %cst_6 {dimension_numbers = #tpu.dot_dimension_numbers<[1], [0], [0], [1], [0, 0, 1, 1], [], []>} : vector<8x8xf32>, vector<8x640xf32>, vector<8x640xf32> -> vector<8x640xf32>
    %22 = arith.addf %18, %21 : vector<8x640xf32>
    %23 = vector.extract_strided_slice %5 {offsets = [0, 19], sizes = [8, 640], strides = [1, 1]} : vector<8x768xf32> to vector<8x640xf32>
    %24 = vector.extract_strided_slice %1 {offsets = [0, 32], sizes = [8, 8], strides = [1, 1]} : vector<8x72xf32> to vector<8x8xf32>
    %cst_7 = arith.constant dense<0.000000e+00> : vector<8x640xf32>
    %25 = tpu.matmul %24, %23, %cst_7 {dimension_numbers = #tpu.dot_dimension_numbers<[1], [0], [0], [1], [0, 0, 1, 1], [], []>} : vector<8x8xf32>, vector<8x640xf32>, vector<8x640xf32> -> vector<8x640xf32>
    %26 = arith.addf %22, %25 : vector<8x640xf32>
    %27 = vector.extract_strided_slice %5 {offsets = [0, 20], sizes = [8, 640], strides = [1, 1]} : vector<8x768xf32> to vector<8x640xf32>
    %28 = vector.extract_strided_slice %1 {offsets = [0, 40], sizes = [8, 8], strides = [1, 1]} : vector<8x72xf32> to vector<8x8xf32>
    %cst_8 = arith.constant dense<0.000000e+00> : vector<8x640xf32>
    %29 = tpu.matmul %28, %27, %cst_8 {dimension_numbers = #tpu.dot_dimension_numbers<[1], [0], [0], [1], [0, 0, 1, 1], [], []>} : vector<8x8xf32>, vector<8x640xf32>, vector<8x640xf32> -> vector<8x640xf32>
    %30 = arith.addf %26, %29 : vector<8x640xf32>
    %31 = vector.extract_strided_slice %5 {offsets = [0, 36], sizes = [8, 640], strides = [1, 1]} : vector<8x768xf32> to vector<8x640xf32>
    %32 = vector.extract_strided_slice %1 {offsets = [0, 48], sizes = [8, 8], strides = [1, 1]} : vector<8x72xf32> to vector<8x8xf32>
    %cst_9 = arith.constant dense<0.000000e+00> : vector<8x640xf32>
    %33 = tpu.matmul %32, %31, %cst_9 {dimension_numbers = #tpu.dot_dimension_numbers<[1], [0], [0], [1], [0, 0, 1, 1], [], []>} : vector<8x8xf32>, vector<8x640xf32>, vector<8x640xf32> -> vector<8x640xf32>
    %34 = arith.addf %30, %33 : vector<8x640xf32>
    %35 = vector.extract_strided_slice %5 {offsets = [0, 37], sizes = [8, 640], strides = [1, 1]} : vector<8x768xf32> to vector<8x640xf32>
    %36 = vector.extract_strided_slice %1 {offsets = [0, 56], sizes = [8, 8], strides = [1, 1]} : vector<8x72xf32> to vector<8x8xf32>
    %cst_10 = arith.constant dense<0.000000e+00> : vector<8x640xf32>
    %37 = tpu.matmul %36, %35, %cst_10 {dimension_numbers = #tpu.dot_dimension_numbers<[1], [0], [0], [1], [0, 0, 1, 1], [], []>} : vector<8x8xf32>, vector<8x640xf32>, vector<8x640xf32> -> vector<8x640xf32>
    %38 = arith.addf %34, %37 : vector<8x640xf32>
    %39 = vector.extract_strided_slice %5 {offsets = [0, 38], sizes = [8, 640], strides = [1, 1]} : vector<8x768xf32> to vector<8x640xf32>
    %40 = vector.extract_strided_slice %1 {offsets = [0, 64], sizes = [8, 8], strides = [1, 1]} : vector<8x72xf32> to vector<8x8xf32>
    %cst_11 = arith.constant dense<0.000000e+00> : vector<8x640xf32>
    %41 = tpu.matmul %40, %39, %cst_11 {dimension_numbers = #tpu.dot_dimension_numbers<[1], [0], [0], [1], [0, 0, 1, 1], [], []>} : vector<8x8xf32>, vector<8x640xf32>, vector<8x640xf32> -> vector<8x640xf32>
    %42 = arith.addf %38, %41 : vector<8x640xf32>
    %43 = vector.broadcast %2 : vector<8x1xf32> to vector<8x640xf32>
    %44 = arith.addf %42, %43 : vector<8x640xf32>
    %cst_12 = arith.constant 0.000000e+00 : f32
    %45 = vector.broadcast %cst_12 : f32 to vector<8x640xf32>
    %46 = arith.maximumf %44, %45 : vector<8x640xf32>
    %47 = tpu.iota {dimensions = array<i32: 0>} : vector<640x2xi32>
    %48 = tpu.iota {dimensions = array<i32: 1>} : vector<640x2xi32>
    %c324_i32 = arith.constant 324 : i32
    %49 = vector.broadcast %c324_i32 : i32 to vector<640x2xi32>
    %50 = arith.muli %48, %49 : vector<640x2xi32>
    %51 = arith.subi %47, %50 : vector<640x2xi32>
    %c0_i32 = arith.constant 0 : i32
    %52 = vector.broadcast %c0_i32 : i32 to vector<640x2xi32>
    %53 = arith.cmpi sge, %51, %52 : vector<640x2xi32>
    %c324_i32_13 = arith.constant 324 : i32
    %54 = vector.broadcast %c324_i32_13 : i32 to vector<640x2xi32>
    %55 = arith.cmpi slt, %51, %54 : vector<640x2xi32>
    %56 = arith.andi %53, %55 : vector<640x2xi1>
    %57 = arith.sitofp %51 : vector<640x2xi32> to vector<640x2xf32>
    %cst_14 = arith.constant 5.000000e-01 : f32
    %58 = vector.broadcast %cst_14 : f32 to vector<640x2xf32>
    %59 = arith.addf %57, %58 : vector<640x2xf32>
    %cst_15 = arith.constant 0.055555556 : f32
    %60 = vector.broadcast %cst_15 : f32 to vector<640x2xf32>
    %61 = arith.mulf %59, %60 : vector<640x2xf32>
    %62 = math.floor %61 : vector<640x2xf32>
    %cst_16 = arith.constant 1.800000e+01 : f32
    %63 = vector.broadcast %cst_16 : f32 to vector<640x2xf32>
    %64 = arith.mulf %62, %63 : vector<640x2xf32>
    %65 = arith.subf %57, %64 : vector<640x2xf32>
    %cst_17 = arith.constant 1.600000e+01 : f32
    %66 = vector.broadcast %cst_17 : f32 to vector<640x2xf32>
    %67 = arith.cmpf olt, %62, %66 : vector<640x2xf32>
    %68 = arith.andi %56, %67 : vector<640x2xi1>
    %cst_18 = arith.constant 1.600000e+01 : f32
    %69 = vector.broadcast %cst_18 : f32 to vector<640x2xf32>
    %70 = arith.cmpf olt, %65, %69 : vector<640x2xf32>
    %71 = arith.andi %68, %70 : vector<640x2xi1>
    %72 = arith.extui %71 : vector<640x2xi1> to vector<640x2xi32>
    %73 = arith.sitofp %72 : vector<640x2xi32> to vector<640x2xf32>
    %cst_19 = arith.constant 3.906250e-03 : f32
    %74 = vector.broadcast %cst_19 : f32 to vector<640x2xf32>
    %75 = arith.mulf %73, %74 : vector<640x2xf32>
    %cst_20 = arith.constant dense<0.000000e+00> : vector<8x2xf32>
    %76 = tpu.matmul %46, %75, %cst_20 {dimension_numbers = #tpu.dot_dimension_numbers<[1], [0], [0], [1], [0, 0, 1, 1], [], []>} : vector<8x640xf32>, vector<640x2xf32>, vector<8x2xf32> -> vector<8x2xf32>
    %cst_21 = arith.constant dense<0.000000e+00> : vector<2x5xf32>
    %77 = tpu.matmul %76, %3, %cst_21 {dimension_numbers = #tpu.dot_dimension_numbers<[0], [0], [1], [1], [0, 1, 1, 1], [], []>} : vector<8x2xf32>, vector<8x5xf32>, vector<2x5xf32> -> vector<2x5xf32>
    %78 = vector.broadcast %4 : vector<1x5xf32> to vector<2x5xf32>
    %79 = arith.addf %77, %78 : vector<2x5xf32>
    %c0_22 = arith.constant 0 : index
    %c0_23 = arith.constant 0 : index
    %80 = vector.load %arg2[%c0_22, %c0_23] : memref<2x5xf32, #tpu.memory_space<vmem>>, vector<2x5xf32>
    tpu.vector_store %arg2[%c0_22, %c0_23], %79 {strides = array<i32>} : memref<2x5xf32, #tpu.memory_space<vmem>>, vector<2x5xf32>,
    return
  }
}

</mosaic_0001>

<bundles_post_ra>
// kernel: meta_test_parallel_forward.1
= control target key start
LH: loop header
LB: loop body
LE: loop exit
PB: predicated region body
PF: predicated region fallthrough
CT: control target
= control target key end

     0   :  { %s3109_s15 = smov 120   ;;  %s5443_s0 = inlined_call_operand.vmem [shape: f32[8,768], index: 0, kind: input, shape index: {}]   ;;  %s5444_s1 = inlined_call_operand.vmem [shape: f32[8,83], index: 1, kind: input, shape index: {}]   ;;  %s5445_s2 = inlined_call_operand.hbm [shape: f32[2,5], index: 2, kind: output, shape index: {}]  }
   0x1   :  { %v3148_v0 = vld [vmem:[%s5443_s0] sm:$0xff]  ;;  %v3153_v1 = vld [vmem:[%s5443_s0 + $0x8] sm:$0xff] }
   0x2   :  { %v3158_v2 = vld [vmem:[%s5444_s1] sm:$0xff]  ;;  %v2966_v3 = vpack.i.bf16 %v3153_v1, %v3148_v0  ;;  %v18_v5 = vld [vmem:[%s5443_s0 + $0x28] sm:$0xff] }
   0x3   :  { %20 = vrot.lane.b32.xlu1 %v3158_v2, %s3109_s15  ;;  %v17_v4 = vld [vmem:[%s5443_s0 + $0x20] sm:$0xff] }
   0x4   :  { %251 = vmatpush.msra.mxu1 %v17_v4 }
   0x5   :  { %7 = vsyncpa [#allocation3], 0  ;;  %s3110_s20 = smov 127   ;;  %s3111_s21 = smov 126   ;;  %v3172_v6 = vld [vmem:[%s5443_s0 + $0x10] sm:$0xff]  ;;  %v3177_v7 = vld [vmem:[%s5443_s0 + $0x18] sm:$0xff]  ;;  %v2976_v8 = vpack.i.bf16 %v18_v5, %v17_v4  ;;  %v3016_v14 = vpack.i.bf16 %v3148_v0, %v3153_v1 }
   0x6   :  { %2967 = vrot.lane.b32.xlu0 %v2966_v3, %s3110_s20  ;;  %2982 = vrot.lane.b32.xlu2 %v2966_v3, %s3111_s21  ;;  %v2971_v9 = vpack.i.bf16 %v3177_v7, %v3172_v6  ;;  %s3112_s26 = smov 112   ;;  %v2991_v10 = vpack.i.bf16 %v3177_v7, %v18_v5  ;;  %v2986_v11 = vpack.i.bf16 %v17_v4, %v3172_v6  ;;  %s3113_s27 = smov 110   ;;  %vm5446_vm0 = vcmask 64512  }
   0x7   :  { %v3001_v12 = vpack.i.bf16 %v17_v4, %v3177_v7  ;;  %v3006_v13 = vpack.i.bf16 %v18_v5, %v3172_v6  ;;  %s3114_s0 = smov 104   ;;  %s3115_s28 = smov 96   ;;  %v3026_v15 = vpack.i.bf16 %v3172_v6, %v3153_v1  ;;  %v3031_v16 = vpack.i.bf16 %v3177_v7, %v3148_v0  ;;  %2828 = vmatmul.msk.f32.vlgmr.msra.gmra.mxu1 %vm5446_vm0, %v3158_v2 }
   0x8   :  { %s3116_s29 = smov 109   ;;  %s3117_s30 = smov 108   ;;  %vm40_vm1 = vcmask 1039360   ;;  %vm270_vm2 = vcmask 1031168   ;;  %vm402_vm3 = vcmask 900096   ;;  %vm534_vm4 = vcmask 891904  }
   0x9   :  { %s3118_s3 = smov 88   ;;  %s3119_s4 = smov 92   ;;  %vm666_vm5 = vcmask 883712   ;;  %vm798_vm6 = vcmask 752640   ;;  %vm930_vm7 = vcmask 744448   ;;  %vm1062_vm8 = vcmask 736256  }
   0xa   :  { %s3120_s5 = smov 80   ;;  %s3121_s6 = smov 91  }
   0xb   :  { %2977 = vrot.lane.b32.xlu1 %v2976_v8, %s3110_s20  ;;  %s3122_s7 = smov 72   ;;  %s3123_s8 = smov 90  }
   0xc   :  { %s3124_s9 = smov 64   ;;  %s3127_s12 = smov 55  }
   0xd   :  { %s3128_s13 = smov 50   ;;  %s2810_s17 = sshll.u32 %s5445_s2, 4  ;;  %s2811_s17 = int_to_ptr.hbm [resolvable:$true] %s2810_s17 }
   0xe   :  { %2972 = vrot.lane.b32.xlu0 %v2971_v9, %s3110_s20  ;;  %256 = vrot.lane.b32.xlu2 %v3158_v2, %s3112_s26 }
  0x13   :  { %2992 = vrot.lane.b32.xlu1 %v2991_v10, %s3111_s21 }
  0x16   :  { %2987 = vrot.lane.b32.xlu0 %v2986_v11, %s3111_s21  ;;  %2997 = vrot.lane.b32.xlu2 %v2966_v3, %s3113_s27 }
  0x1b   :  { %388 = vrot.lane.b32.xlu1 %v3158_v2, %s3114_s0 }
  0x1e   :  { %3002 = vrot.lane.b32.xlu0 %v3001_v12, %s3113_s27  ;;  %3007 = vrot.lane.b32.xlu2 %v3006_v13, %s3113_s27 }
  0x23   :  { %520 = vrot.lane.b32.xlu1 %v3158_v2, %s3115_s28 }
  0x26   :  { %3012 = vrot.lane.b32.xlu0 %v2971_v9, %s3116_s29  ;;  %3017 = vrot.lane.b32.xlu2 %v3016_v14, %s3116_s29 }
  0x2b   :  { %3027 = vrot.lane.b32.xlu1 %v3026_v15, %s3117_s30 }
  0x2e   :  { %3022 = vrot.lane.b32.xlu0 %v2976_v8, %s3116_s29  ;;  %652 = vrot.lane.b32.xlu2 %v3158_v2, %s3118_s3 }
  0x33   :  { %3037 = vrot.lane.b32.xlu1 %v2966_v3, %s3119_s4 }
  0x36   :  { %3032 = vrot.lane.b32.xlu0 %v3031_v16, %s3117_s30  ;;  %784 = vrot.lane.b32.xlu2 %v3158_v2, %s3120_s5 }
  0x3b   :  { %3047 = vrot.lane.b32.xlu1 %v2986_v11, %s3119_s4 }
  0x3e   :  { %3042 = vrot.lane.b32.xlu0 %v2976_v8, %s3117_s30  ;;  %3052 = vrot.lane.b32.xlu2 %v2991_v10, %s3119_s4 }
  0x43   :  { %3062 = vrot.lane.b32.xlu1 %v3001_v12, %s3121_s6 }
  0x46   :  { %3057 = vrot.lane.b32.xlu0 %v2966_v3, %s3121_s6  ;;  %916 = vrot.lane.b32.xlu2 %v3158_v2, %s3122_s7 }
  0x4b   :  { %3072 = vrot.lane.b32.xlu1 %v2971_v9, %s3123_s8 }
  0x4e   :  { %3067 = vrot.lane.b32.xlu0 %v3006_v13, %s3121_s6  ;;  %1048 = vrot.lane.b32.xlu2 %v3158_v2, %s3124_s9 }
  0x53   :  { %1058 = vrot.lane.b32.xlu1 %v17_v4, %s3123_s8 }
  0x56   :  { %3077 = vrot.lane.b32.xlu0 %v3016_v14, %s3123_s8  ;;  %1060 = vrot.lane.b32.xlu2 %v18_v5, %s3123_s8 }
  0x60   :  { %v2983_v17 = vpop.permute.xlu2 %2982 }
  0x61   :  { %v2985_v28 = vunpack.i.h.bf16 %v2983_v17  ;;  %v2984_v30 = vunpack.i.l.bf16 %v2983_v17 }
  0x63   :  { %v271_v37 = vsel %vm270_vm2, %v2984_v30, %v2985_v28 }
  0x68   :  { %v3200_v18 = vpop.permute.xlu2 %256 }
  0x70   :  { %v2998_v24 = vpop.permute.xlu2 %2997 }
  0x71   :  { %v3000_v50 = vunpack.i.h.bf16 %v2998_v24  ;;  %v2999_v51 = vunpack.i.l.bf16 %v2998_v24 }
  0x73   :  { %v403_v57 = vsel %vm402_vm3, %v2999_v51, %v3000_v50 }
  0x75   :  { %v21_v19 = vpop.permute.xlu1 %20 }
  0x78   :  { %v2968_v20 = vpop.permute.xlu0 %2967  ;;  %v3008_v38 = vpop.permute.xlu2 %3007 }
  0x79   :  { %v2970_v21 = vunpack.i.h.bf16 %v2968_v20  ;;  %v2969_v22 = vunpack.i.l.bf16 %v2968_v20  ;;  %v3009_v52 = vunpack.i.l.bf16 %v3008_v38  ;;  %v3010_v62 = vunpack.i.h.bf16 %v3008_v38 }
  0x7b   :  { %v41_v23 = vsel %vm40_vm1, %v2969_v22, %v2970_v21  ;;  %v404_v59 = vsel %vm402_vm3, %v3000_v50, %v3009_v52  ;;  %v3125_v50 = vmov 72  }
  0x7c   :  { %69 = vmatpush.msra.mxu0 %v41_v23  ;;  %3081 = vset.pattern.permute.xlu0 %v3125_v50 }
  0x7d   :  { %2819 = vmatmul.msk.f32.vlgmr.msra.gmra.mxu0 %vm5446_vm0, %v21_v19  ;;  %v2978_v25 = vpop.permute.xlu1 %2977  ;;  %1181 = vperm.xlu0 %3081, %v3158_v2  }
  0x7e   :  { %v2980_v26 = vunpack.i.h.bf16 %v2978_v25  ;;  %v2979_v27 = vunpack.i.l.bf16 %v2978_v25 }
  0x80   :  { %v2973_v29 = vpop.permute.xlu0 %2972  ;;  %v45_v33 = vsel %vm40_vm1, %v2979_v27, %v2980_v26  ;;  %v3018_v53 = vpop.permute.xlu2 %3017 }
  0x81   :  { %v2975_v31 = vunpack.i.h.bf16 %v2973_v29  ;;  %v2974_v32 = vunpack.i.l.bf16 %v2973_v29  ;;  %149 = vmatpush.msrb.mxu0 %v45_v33  ;;  %v3019_v63 = vunpack.i.l.bf16 %v3018_v53 }
  0x83   :  { %v42_v34 = vsel %vm40_vm1, %v2970_v21, %v2974_v32  ;;  %v43_v35 = vsel %vm40_vm1, %v2974_v32, %v2975_v31  ;;  %v44_v36 = vsel %vm40_vm1, %v2975_v31, %v2979_v27  ;;  %171 = vmatpush.msra.mxu0 %v3148_v0 }
  0x84   :  { %89 = vmatpush.msra.mxu3 %v42_v34  ;;  %109 = vmatpush.msra.mxu2 %v43_v35 }
  0x85   :  { %2820 = vmatmul.msk.f32.vlgmr.msra.gmra.mxu3 %vm5446_vm0, %v21_v19  ;;  %2821 = vmatmul.msk.f32.vlgmr.msra.gmra.mxu2 %vm5446_vm0, %v21_v19  ;;  %v2993_v39 = vpop.permute.xlu1 %2992 }
  0x86   :  { %129 = vmatpush.msrb.mxu3 %v44_v36  ;;  %2823 = vmatmul.msk.f32.vlgmr.msrb.gmra.mxu0 %vm5446_vm0, %v21_v19  ;;  %v2995_v40 = vunpack.i.h.bf16 %v2993_v39  ;;  %v2994_v44 = vunpack.i.l.bf16 %v2993_v39 }
  0x87   :  { %191 = vmatpush.msrb.mxu2 %v3153_v1  ;;  %231 = vmatpush.msrb.mxu0 %v3177_v7  ;;  %v3020_v1 = vunpack.i.h.bf16 %v3018_v53 }
  0x88   :  { %211 = vmatpush.msra.mxu3 %v3172_v6  ;;  %v2988_v41 = vpop.permute.xlu0 %2987  ;;  %v3243_v5 = vpop.permute.xlu2 %652 }
  0x89   :  { %298 = vmatpush.msra.mxu2 %v271_v37  ;;  %v2990_v42 = vunpack.i.h.bf16 %v2988_v41  ;;  %v2989_v43 = vunpack.i.l.bf16 %v2988_v41  ;;  %v535_v9 = vsel %vm534_vm4, %v3020_v1, %v3019_v63 }
  0x8b   :  { %v274_v45 = vsel %vm270_vm2, %v2995_v40, %v2990_v42  ;;  %v272_v46 = vsel %vm270_vm2, %v2985_v28, %v2989_v43  ;;  %v273_v47 = vsel %vm270_vm2, %v2989_v43, %v2995_v40  ;;  %v275_v48 = vsel %vm270_vm2, %v2990_v42, %v2994_v44 }
  0x8c   :  { %358 = vmatpush.msrb.mxu1 %v274_v45 }
  0x8d   :  { %2822 = vmatmul.msk.f32.vlgmr.msrb.gmra.mxu3 %vm5446_vm0, %v21_v19  ;;  %2825 = vmatmul.msk.f32.vlgmr.msrb.gmra.mxu2 %vm5446_vm0, %v3158_v2  ;;  %v3225_v49 = vpop.permute.xlu1 %388 }
  0x8e   :  { %2824 = vmatmul.msk.f32.vlgmr.msra.gmra.mxu0 %vm5446_vm0, %v3158_v2  ;;  %318 = vmatpush.msrb.mxu3 %v272_v46 }
  0x8f   :  { %2832 = vmatmul.msk.f32.vlgmr.msrb.gmra.mxu1 %vm5446_vm0, %v3200_v18  ;;  %338 = vmatpush.msra.mxu0 %v273_v47 }
  0x90   :  { %v3003_v54 = vpop.permute.xlu0 %3002  ;;  %378 = vmatpush.msrb.mxu2 %v275_v48  ;;  %v3258_v17 = vpop.permute.xlu2 %784 }
  0x91   :  { %v3005_v55 = vunpack.i.h.bf16 %v3003_v54  ;;  %v3004_v56 = vunpack.i.l.bf16 %v3003_v54 }
  0x93   :  { %v405_v58 = vsel %vm402_vm3, %v3009_v52, %v3004_v56  ;;  %v406_v60 = vsel %vm402_vm3, %v3004_v56, %v3005_v55  ;;  %v407_v6 = vsel %vm402_vm3, %v3005_v55, %v3010_v62 }
  0x94   :  { %470 = vmatpush.msra.mxu1 %v405_v58 }
  0x95   :  { %2826 = vmatmul.msk.f32.vlgmr.msra.gmra.mxu3 %vm5446_vm0, %v3158_v2  ;;  %2829 = vmatmul.msk.f32.vlgmr.msra.gmra.mxu2 %vm5446_vm0, %v3200_v18  ;;  %v3239_v61 = vpop.permute.xlu1 %520 }
  0x96   :  { %2827 = vmatmul.msk.f32.vlgmr.msrb.gmra.mxu0 %vm5446_vm0, %v3158_v2  ;;  %430 = vmatpush.msra.mxu3 %v403_v57 }
  0x97   :  { %450 = vmatpush.msrb.mxu0 %v404_v59  ;;  %490 = vmatpush.msra.mxu2 %v406_v60 }
  0x98   :  { %v3013_v0 = vpop.permute.xlu0 %3012  ;;  %2836 = vmatmul.msk.f32.vlgmr.msra.gmra.mxu1 %vm5446_vm0, %v3225_v49  ;;  %v3053_v29 = vpop.permute.xlu2 %3052 }
  0x99   :  { %v3015_v3 = vunpack.i.h.bf16 %v3013_v0  ;;  %v3014_v4 = vunpack.i.l.bf16 %v3013_v0  ;;  %v3055_v34 = vunpack.i.h.bf16 %v3053_v29  ;;  %v3054_v37 = vunpack.i.l.bf16 %v3053_v29 }
  0x9b   :  { %v536_v7 = vsel %vm534_vm4, %v3019_v63, %v3014_v4  ;;  %v537_v8 = vsel %vm534_vm4, %v3014_v4, %v3015_v3 }
  0x9c   :  { %582 = vmatpush.msrb.mxu1 %v536_v7 }
  0x9d   :  { %2830 = vmatmul.msk.f32.vlgmr.msrb.gmra.mxu3 %vm5446_vm0, %v3200_v18  ;;  %2833 = vmatmul.msk.f32.vlgmr.msrb.gmra.mxu2 %vm5446_vm0, %v3200_v18  ;;  %v3028_v10 = vpop.permute.xlu1 %3027 }
  0x9e   :  { %2831 = vmatmul.msk.f32.vlgmr.msra.gmra.mxu0 %vm5446_vm0, %v3200_v18  ;;  %510 = vmatpush.msrb.mxu3 %v407_v6  ;;  %v3030_v12 = vunpack.i.h.bf16 %v3028_v10  ;;  %v3029_v15 = vunpack.i.l.bf16 %v3028_v10  ;;  %v1194_v10 = vlaneseq }
  0x9f   :  { %602 = vmatpush.msrb.mxu2 %v537_v8  ;;  %562 = vmatpush.msra.mxu0 %v535_v9 }
  0xa0   :  { %v3023_v11 = vpop.permute.xlu0 %3022  ;;  %2840 = vmatmul.msk.f32.vlgmr.msrb.gmra.mxu1 %vm5446_vm0, %v3239_v61  ;;  %v668_v18 = vsel %vm666_vm5, %v3029_v15, %v3030_v12  ;;  %v917_v45 = vpop.permute.xlu2 %916 }
  0xa1   :  { %v3025_v13 = vunpack.i.h.bf16 %v3023_v11  ;;  %v3024_v14 = vunpack.i.l.bf16 %v3023_v11  ;;  %v3328_v11 = vshrl.u32 %v1194_v10, 7 }
  0xa3   :  { %v538_v16 = vsel %vm534_vm4, %v3015_v3, %v3024_v14  ;;  %v539_v19 = vsel %vm534_vm4, %v3024_v14, %v3025_v13  ;;  %v1210_v13 = vadd.s32 120, %v3328_v11 }
  0xa5   :  { %2834 = vmatmul.msk.f32.vlgmr.msra.gmra.mxu3 %vm5446_vm0, %v3225_v49  ;;  %2837 = vmatmul.msk.f32.vlgmr.msra.gmra.mxu2 %vm5446_vm0, %v3225_v49  ;;  %v3038_v20 = vpop.permute.xlu1 %3037 }
  0xa6   :  { %2835 = vmatmul.msk.f32.vlgmr.msrb.gmra.mxu0 %vm5446_vm0, %v3225_v49  ;;  %622 = vmatpush.msra.mxu3 %v538_v16  ;;  %v3040_v22 = vunpack.i.h.bf16 %v3038_v20  ;;  %v3039_v23 = vunpack.i.l.bf16 %v3038_v20  ;;  %v1209_v16 = vadd.s32 112, %v3328_v11 }
  0xa7   :  { %642 = vmatpush.msrb.mxu0 %v539_v19  ;;  %714 = vmatpush.msra.mxu2 %v668_v18  ;;  %v1208_v18 = vadd.s32 104, %v3328_v11 }
  0xa8   :  { %v3033_v21 = vpop.permute.xlu0 %3032  ;;  %v799_v28 = vsel %vm798_vm6, %v3039_v23, %v3040_v22  ;;  %v1049_v58 = vpop.permute.xlu2 %1048  ;;  %v1207_v23 = vadd.s32 96, %v3328_v11 }
  0xa9   :  { %v3035_v24 = vunpack.i.h.bf16 %v3033_v21  ;;  %v3034_v25 = vunpack.i.l.bf16 %v3033_v21 }
  0xab   :  { %v667_v26 = vsel %vm666_vm5, %v3034_v25, %v3029_v15  ;;  %v669_v27 = vsel %vm666_vm5, %v3030_v12, %v3035_v24  ;;  %v1276_v12 = vand.u32 127, %v1194_v10 }
  0xac   :  { %694 = vmatpush.msra.mxu1 %v667_v26 }
  0xad   :  { %2838 = vmatmul.msk.f32.vlgmr.msrb.gmra.mxu3 %vm5446_vm0, %v3225_v49  ;;  %2841 = vmatmul.msk.f32.vlgmr.msrb.gmra.mxu2 %vm5446_vm0, %v3239_v61  ;;  %v3048_v30 = vpop.permute.xlu1 %3047  ;;  %v3331_v14 = vmul.u32 324, %v1276_v12 }
  0xae   :  { %2839 = vmatmul.msk.f32.vlgmr.msra.gmra.mxu0 %vm5446_vm0, %v3239_v61  ;;  %2844 = vmatmul.msk.f32.vlgmr.msra.gmra.mxu1 %vm5446_vm0, %v3243_v5  ;;  %v3050_v32 = vunpack.i.h.bf16 %v3048_v30  ;;  %v3049_v33 = vunpack.i.l.bf16 %v3048_v30 }
  0xaf   :  { %734 = vmatpush.msrb.mxu3 %v669_v27  ;;  %826 = vmatpush.msrb.mxu2 %v799_v28  ;;  %v1293_v15 = vsub.s32 %v1210_v13, %v3331_v14  ;;  %v1292_v19 = vsub.s32 %v1209_v16, %v3331_v14  ;;  %v3340_v27 = vsub.s32 %v1207_v23, %v3331_v14  ;;  %v1206_v28 = vadd.s32 88, %v3328_v11 }
  0xb0   :  { %v3043_v31 = vpop.permute.xlu0 %3042  ;;  %v800_v40 = vsel %vm798_vm6, %v3040_v22, %v3049_v33  ;;  %v802_v41 = vsel %vm798_vm6, %v3055_v34, %v3050_v32  ;;  %v801_v42 = vsel %vm798_vm6, %v3049_v33, %v3055_v34  ;;  %v803_v43 = vsel %vm798_vm6, %v3050_v32, %v3054_v37 }
  0xb1   :  { %v3045_v35 = vunpack.i.h.bf16 %v3043_v31  ;;  %v3044_v36 = vunpack.i.l.bf16 %v3043_v31  ;;  %v1612_v21 = vcvt.s32.f32 %v1292_v19  ;;  %v1291_v22 = vsub.s32 %v1208_v18, %v3331_v14 }
  0xb2   :  { %v1610_v32 = vcvt.s32.f32 %v3340_v27  ;;  %v3347_v34 = vsub.s32 %v1206_v28, %v3331_v14  ;;  %vm1373_vm9 = vcmp.ge.s32.totalorder %v1293_v15, 0  ;;  %vm1453_vm10 = vcmp.lt.s32.totalorder %v1293_v15, 324 }
  0xb3   :  { %v670_v38 = vsel %vm666_vm5, %v3035_v24, %v3044_v36  ;;  %v671_v39 = vsel %vm666_vm5, %v3044_v36, %v3045_v35  ;;  %v1692_v25 = vadd.f32 0.5, %v1612_v21  ;;  %v1611_v26 = vcvt.s32.f32 %v1291_v22  ;;  %vm1533_vm11 = vmand %vm1373_vm9, %vm1453_vm10 }
  0xb4   :  { %754 = vmatpush.msra.mxu0 %v670_v38  ;;  %774 = vmatpush.msrb.mxu1 %v671_v39  ;;  %v1205_v35 = vadd.s32 80, %v3328_v11  ;;  %v1690_v39 = vadd.f32 0.5, %v1610_v32  ;;  %vm1372_vm15 = vcmp.ge.s32.totalorder %v1292_v19, 0  ;;  %vm1452_vm1 = vcmp.lt.s32.totalorder %v1292_v19, 324 }
  0xb5   :  { %2842 = vmatmul.msk.f32.vlgmr.msra.gmra.mxu3 %vm5446_vm0, %v3239_v61  ;;  %2845 = vmatmul.msk.f32.vlgmr.msra.gmra.mxu2 %vm5446_vm0, %v3243_v5  ;;  %v3063_v44 = vpop.permute.xlu1 %3062  ;;  %v1772_v30 = vmul.f32 0.055555556, %v1692_v25  ;;  %v1691_v31 = vadd.f32 0.5, %v1611_v26  ;;  %vm1532_vm4 = vmand %vm1372_vm15, %vm1452_vm1  ;;  %vm1371_vm6 = vcmp.ge.s32.totalorder %v1291_v22, 0 }
  0xb6   :  { %2843 = vmatmul.msk.f32.vlgmr.msrb.gmra.mxu0 %vm5446_vm0, %v3239_v61  ;;  %2848 = vmatmul.msk.f32.vlgmr.msrb.gmra.mxu1 %vm5446_vm0, %v3243_v5  ;;  %v3065_v47 = vunpack.i.h.bf16 %v3063_v44  ;;  %v3064_v51 = vunpack.i.l.bf16 %v3063_v44 }
  0xb7   :  { %846 = vmatpush.msra.mxu3 %v800_v40  ;;  %886 = vmatpush.msra.mxu1 %v802_v41  ;;  %v1852_v37 = vfloor.f32 %v1772_v30  ;;  %v1771_v38 = vmul.f32 0.055555556, %v1691_v31  ;;  %v1609_v40 = vcvt.s32.f32 %v3347_v34  ;;  %v3352_v41 = vsub.s32 %v1205_v35, %v3331_v14 }
  0xb8   :  { %v3058_v46 = vpop.permute.xlu0 %3057  ;;  %866 = vmatpush.msrb.mxu0 %v801_v42  ;;  %906 = vmatpush.msra.mxu2 %v803_v43  ;;  %v934_v53 = vsel %vm930_vm7, %v3064_v51, %v3065_v47  ;;  %v1204_v42 = vadd.s32 72, %v3328_v11 }
  0xb9   :  { %v3060_v48 = vunpack.i.h.bf16 %v3058_v46  ;;  %v3059_v49 = vunpack.i.l.bf16 %v3058_v46  ;;  %v1932_v44 = vmul.f32 18.0, %v1852_v37  ;;  %v1770_v46 = vmul.f32 0.055555556, %v1690_v39 }
  0xba   :  { %vm3357_vm3 = vcmp.lt.f32.partialorder %v1852_v37, 16.0 }
  0xbb   :  { %v931_v52 = vsel %vm930_vm7, %v3059_v49, %v3060_v48 }
  0xbd   :  { %2846 = vmatmul.msk.f32.vlgmr.msrb.gmra.mxu3 %vm5446_vm0, %v3243_v5  ;;  %2849 = vmatmul.msk.f32.vlgmr.msrb.gmra.mxu2 %vm5446_vm0, %v3258_v17  ;;  %v3073_v54 = vpop.permute.xlu1 %3072 }
  0xbe   :  { %2847 = vmatmul.msk.f32.vlgmr.msra.gmra.mxu0 %vm5446_vm0, %v3243_v5  ;;  %2852 = vmatmul.msk.f32.vlgmr.msra.gmra.mxu1 %vm5446_vm0, %v3258_v17  ;;  %v3075_v55 = vunpack.i.h.bf16 %v3073_v54  ;;  %v3074_v59 = vunpack.i.l.bf16 %v3073_v54  ;;  %v1061_v5 = vpop.permute.xlu2 %1060 }
  0xbf   :  { %958 = vmatpush.msrb.mxu3 %v931_v52  ;;  %1018 = vmatpush.msrb.mxu2 %v934_v53  ;;  %v253_v52 = vpop.f32.mrf.mxu1  ;;  %v3126_v53 = vmov 0.0  }
  0xc0   :  { %v3068_v2 = vpop.permute.xlu0 %3067  ;;  %v1065_v63 = vsel %vm1062_vm8, %v3074_v59, %v3075_v55 }
  0xc1   :  { %v3070_v56 = vunpack.i.h.bf16 %v3068_v2  ;;  %v3069_v57 = vunpack.i.l.bf16 %v3068_v2 }
  0xc3   :  { %v932_v60 = vsel %vm930_vm7, %v3060_v48, %v3069_v57  ;;  %v933_v61 = vsel %vm930_vm7, %v3069_v57, %v3064_v51  ;;  %v935_v62 = vsel %vm930_vm7, %v3065_v47, %v3070_v56  ;;  %v1689_v47 = vadd.f32 0.5, %v1609_v40 }
  0xc4   :  { %978 = vmatpush.msra.mxu0 %v932_v60  ;;  %998 = vmatpush.msrb.mxu1 %v933_v61  ;;  %v2012_v48 = vsub.f32 %v1612_v21, %v1932_v44  ;;  %v1850_v51 = vfloor.f32 %v1770_v46  ;;  %vm1451_vm7 = vcmp.lt.s32.totalorder %v1291_v22, 324  ;;  %v1608_v60 = vcvt.s32.f32 %v3352_v41 }
  0xc5   :  { %2850 = vmatmul.msk.f32.vlgmr.msra.gmra.mxu3 %vm5446_vm0, %v3258_v17  ;;  %2853 = vmatmul.msk.f32.vlgmr.msra.gmra.mxu2 %vm5446_vm0, %v3258_v17  ;;  %v1059_v1 = vpop.permute.xlu1 %1058  ;;  %v1202_v22 = vadd.s32 56, %v3328_v11  ;;  %v1225_v46 = vadd.s32 240, %v3328_v11 }
  0xc6   :  { %2851 = vmatmul.msk.f32.vlgmr.msrb.gmra.mxu0 %vm5446_vm0, %v3258_v17  ;;  %1038 = vmatpush.msra.mxu3 %v935_v62  ;;  %v1066_v6 = vsel %vm1062_vm8, %v3075_v55, %v1059_v1  ;;  %v1067_v9 = vsel %vm1062_vm8, %v1059_v1, %v1061_v5  ;;  %v1613_v17 = vcvt.s32.f32 %v1293_v15  ;;  %vm2252_vm5 = vcmp.lt.f32.partialorder %v2012_v48, 16.0 }
  0xc7   :  { %2856 = vmatmul.msk.f32.vlgmr.msrb.gmra.mxu1 %vm5446_vm0, %v917_v45  ;;  %1130 = vmatpush.msra.mxu2 %v1065_v63  ;;  %v1930_v57 = vmul.f32 18.0, %v1850_v51  ;;  %vm3378_vm1 = vcmp.lt.f32.partialorder %v1850_v51, 16.0  ;;  %v3383_v5 = vsub.s32 %v1204_v42, %v3331_v14  ;;  %v3444_v31 = vsub.s32 %v1202_v22, %v3331_v14 }
  0xc8   :  { %v3078_v0 = vpop.permute.xlu0 %3077  ;;  %v1693_v20 = vadd.f32 0.5, %v1613_v17 }
  0xc9   :  { %v3080_v3 = vunpack.i.h.bf16 %v3078_v0  ;;  %v3079_v4 = vunpack.i.l.bf16 %v3078_v0  ;;  %v2010_v63 = vsub.f32 %v1610_v32, %v1930_v57  ;;  %v1607_v16 = vcvt.s32.f32 %v3383_v5 }
  0xca   :  { %v1773_v24 = vmul.f32 0.055555556, %v1693_v20  ;;  %v1226_v32 = vadd.s32 248, %v3328_v11  ;;  %v1605_v44 = vcvt.s32.f32 %v3444_v31 }
  0xcb   :  { %v1064_v7 = vsel %vm1062_vm8, %v3079_v4, %v3074_v59  ;;  %v1063_v8 = vsel %vm1062_vm8, %v3080_v3, %v3079_v4  ;;  %vm2172_vm8 = vmand %vm1532_vm4, %vm3357_vm3  ;;  %v1769_v59 = vmul.f32 0.055555556, %v1689_v47  ;;  %vm2250_vm3 = vcmp.lt.f32.partialorder %v2010_v63, 16.0 }
  0xcc   :  { %1110 = vmatpush.msra.mxu1 %v1064_v7  ;;  %1090 = vmatpush.msrb.mxu0 %v1063_v8  ;;  %v1853_v29 = vfloor.f32 %v1773_v24  ;;  %vm2332_vm10 = vmand %vm2172_vm8, %vm2252_vm5  ;;  %v1688_v4 = vadd.f32 0.5, %v1608_v60  ;;  %vm1369_vm5 = vcmp.ge.s32.totalorder %v3347_v34, 0  ;;  %v1203_v7 = vadd.s32 64, %v3328_v11 }
  0xcd   :  { %2854 = vmatmul.msk.f32.vlgmr.msrb.gmra.mxu3 %vm5446_vm0, %v917_v45  ;;  %2857 = vmatmul.msk.f32.vlgmr.msrb.gmra.mxu2 %vm5446_vm0, %v917_v45  ;;  %v2878_v62 = vsel %vm2332_vm10, 1.0, %v3126_v53  ;;  %v1849_v3 = vfloor.f32 %v1769_v59  ;;  %vm1368_vm10 = vcmp.ge.s32.totalorder %v3352_v41, 0  ;;  %v1687_v25 = vadd.f32 0.5, %v1607_v16 }
  0xce   :  { %2855 = vmatmul.msk.f32.vlgmr.msra.gmra.mxu0 %vm5446_vm0, %v917_v45  ;;  %1150 = vmatpush.msrb.mxu3 %v1066_v6  ;;  %v1933_v36 = vmul.f32 18.0, %v1853_v29  ;;  %vm2093_vm12 = vcmp.lt.f32.partialorder %v1853_v29, 16.0  ;;  %v2572_v0 = vmul.f32 0.00390625, %v2878_v62  ;;  %v1768_v15 = vmul.f32 0.055555556, %v1688_v4 }
  0xcf   :  { %2860 = vmatmul.msk.f32.vlgmr.msra.gmra.mxu1 %vm5446_vm0, %v1049_v58  ;;  %1170 = vmatpush.msra.mxu0 %v1067_v9  ;;  %vm2173_vm13 = vmand %vm1533_vm11, %vm2093_vm12  ;;  %vm1370_vm11 = vcmp.ge.s32.totalorder %v3340_v27, 0  ;;  %vm1450_vm12 = vcmp.lt.s32.totalorder %v3340_v27, 324  ;;  %v1929_v12 = vmul.f32 18.0, %v1849_v3  ;;  %vm3399_vm8 = vcmp.lt.f32.partialorder %v1849_v3, 16.0 }
  0xd0   :  { %v2013_v43 = vsub.f32 %v1613_v17, %v1933_v36  ;;  %vm1530_vm4 = vmand %vm1370_vm11, %vm1450_vm12  ;;  %vm1448_vm11 = vcmp.lt.s32.totalorder %v3352_v41, 324  ;;  %v3408_v17 = vsub.s32 %v1203_v7, %v3331_v14  ;;  %v1848_v21 = vfloor.f32 %v1768_v15 }
  0xd1   :  { %v2009_v20 = vsub.f32 %v1609_v40, %v1929_v12  ;;  %v1767_v29 = vmul.f32 0.055555556, %v1687_v25  ;;  %v1201_v40 = vadd.s32 48, %v3328_v11  ;;  %v1685_v51 = vadd.f32 0.5, %v1605_v44 }
  0xd2   :  { %vm2253_vm14 = vcmp.lt.f32.partialorder %v2013_v43, 16.0  ;;  %v1928_v27 = vmul.f32 18.0, %v1848_v21  ;;  %v1606_v30 = vcvt.s32.f32 %v3408_v17 }
  0xd3   :  { %vm2333_vm2 = vmand %vm2173_vm13, %vm2253_vm14  ;;  %v1765_v59 = vmul.f32 0.055555556, %v1685_v51 }
  0xd4   :  { %v2879_v54 = vsel %vm2333_vm2, 1.0, %v3126_v53  ;;  %vm1531_vm13 = vmand %vm1371_vm6, %vm1451_vm7  ;;  %vm1449_vm6 = vcmp.lt.s32.totalorder %v3347_v34, 324  ;;  %v2008_v35 = vsub.f32 %v1608_v60, %v1928_v27  ;;  %v1686_v39 = vadd.f32 0.5, %v1606_v30 }
  0xd5   :  { %2858 = vmatmul.msk.f32.vlgmr.msra.gmra.mxu3 %vm5446_vm0, %v917_v45  ;;  %2861 = vmatmul.msk.f32.vlgmr.msra.gmra.mxu2 %vm5446_vm0, %v1049_v58  ;;  %v1851_v45 = vfloor.f32 %v1771_v38  ;;  %v2573_v2 = vmul.f32 0.00390625, %v2879_v54  ;;  %vm2170_vm7 = vmand %vm1530_vm4, %vm3378_vm1  ;;  %v1847_v38 = vfloor.f32 %v1767_v29  ;;  %v3496_v60 = vsub.s32 %v1201_v40, %v3331_v14 }
  0xd6   :  { %2859 = vmatmul.msk.f32.vlgmr.msrb.gmra.mxu0 %vm5446_vm0, %v1049_v58  ;;  %vm3415_vm12 = vmand %vm1369_vm5, %vm1449_vm6  ;;  %vm1366_vm6 = vcmp.ge.s32.totalorder %v3408_v17, 0  ;;  %v1766_v49 = vmul.f32 0.055555556, %v1686_v39 }
  0xd7   :  { %v1931_v50 = vmul.f32 18.0, %v1851_v45  ;;  %vm3364_vm9 = vcmp.lt.f32.partialorder %v1851_v45, 16.0  ;;  %2638 = vmatpush.msrb.mxu1 %v2573_v2  ;;  %vm3433_vm1 = vmand %vm1368_vm10, %vm1448_vm11  ;;  %v3465_v45 = vsub.s32 %v1226_v32, %v3331_v14  ;;  %v1927_v47 = vmul.f32 18.0, %v1847_v38 }
  0xd8   :  { %vm2171_vm15 = vmand %vm1531_vm13, %vm3364_vm9  ;;  %vm3473_vm11 = vcmp.lt.f32.partialorder %v1847_v38, 16.0  ;;  %v1604_v13 = vcvt.s32.f32 %v3496_v60 }
  0xd9   :  { %v2011_v55 = vsub.f32 %v1611_v26, %v1931_v50  ;;  %2639 = vmatpush.msrb.mxu1 %v2572_v0  ;;  %vm2330_vm9 = vmand %vm2170_vm7, %vm2250_vm3  ;;  %vm1447_vm3 = vcmp.lt.s32.totalorder %v3383_v5, 324  ;;  %vm1446_vm7 = vcmp.lt.s32.totalorder %v3408_v17, 324  ;;  %v2007_v2 = vsub.f32 %v1607_v16, %v1927_v47 }
  0xda   :  { %v2876_v19 = vsel %vm2330_vm9, 1.0, %v3126_v53  ;;  %vm2169_vm13 = vmand %vm3415_vm12, %vm3399_vm8  ;;  %vm2248_vm8 = vcmp.lt.f32.partialorder %v2008_v35, 16.0  ;;  %vm1365_vm12 = vcmp.ge.s32.totalorder %v3444_v31, 0  ;;  %v1629_v56 = vcvt.s32.f32 %v3465_v45 }
  0xdb   :  { %vm2251_vm14 = vcmp.lt.f32.partialorder %v2011_v55, 16.0  ;;  %v2570_v24 = vmul.f32 0.00390625, %v2876_v19  ;;  %v1846_v55 = vfloor.f32 %v1766_v49  ;;  %v1684_v25 = vadd.f32 0.5, %v1604_v13 }
  0xdc   :  { %vm2331_vm2 = vmand %vm2171_vm15, %vm2251_vm14  ;;  %vm1367_vm14 = vcmp.ge.s32.totalorder %v3383_v5, 0  ;;  %vm2249_vm15 = vcmp.lt.f32.partialorder %v2009_v20, 16.0  ;;  %v1709_v1 = vadd.f32 0.5, %v1629_v56  ;;  %v1845_v5 = vfloor.f32 %v1765_v59 }
  0xdd   :  { %2862 = vmatmul.msk.f32.vlgmr.msrb.gmra.mxu3 %vm5446_vm0, %v1049_v58  ;;  %v2877_v6 = vsel %vm2331_vm2, 1.0, %v3126_v53  ;;  %vm3437_vm2 = vcmp.lt.f32.partialorder %v1848_v21, 16.0  ;;  %vm2329_vm4 = vmand %vm2169_vm13, %vm2249_vm15  ;;  %vm1445_vm13 = vcmp.lt.s32.totalorder %v3444_v31, 324  ;;  %v1926_v62 = vmul.f32 18.0, %v1846_v55 }
  0xde   :  { %2863 = vmatmul.msk.f32.vlgmr.msra.gmra.mxu0 %vm5446_vm0, %v1049_v58  ;;  %v2571_v10 = vmul.f32 0.00390625, %v2877_v6  ;;  %v2875_v34 = vsel %vm2329_vm4, 1.0, %v3126_v53  ;;  %vm2168_vm5 = vmand %vm3433_vm1, %vm3437_vm2  ;;  %vm1469_vm2 = vcmp.lt.s32.totalorder %v3465_v45, 324  ;;  %vm3498_vm4 = vcmp.lt.f32.partialorder %v1846_v55, 16.0 }
  0xdf   :  { %v2569_v37 = vmul.f32 0.00390625, %v2875_v34  ;;  %vm3459_vm9 = vmand %vm1367_vm14, %vm1447_vm3  ;;  %vm1389_vm14 = vcmp.ge.s32.totalorder %v3465_v45, 0  ;;  %vm2247_vm3 = vcmp.lt.f32.partialorder %v2007_v2, 16.0  ;;  %v3519_v6 = vsub.s32 %v1225_v46, %v3331_v14 }
  0xe0   :  { %2640 = vmatpush.msrb.mxu1 %v2571_v10  ;;  %vm2328_vm10 = vmand %vm2168_vm5, %vm2248_vm8  ;;  %v2006_v12 = vsub.f32 %v1606_v30, %v1926_v62  ;;  %v1925_v19 = vmul.f32 18.0, %v1845_v5  ;;  %vm3529_vm8 = vcmp.lt.f32.partialorder %v1845_v5, 16.0  ;;  %v1200_v30 = vadd.s32 40, %v3328_v11 }
  0xe1   :  { %v2874_v50 = vsel %vm2328_vm10, 1.0, %v3126_v53  ;;  %vm2167_vm15 = vmand %vm3459_vm9, %vm3473_vm11  ;;  %vm1364_vm10 = vcmp.ge.s32.totalorder %v3496_v60, 0  ;;  %v1764_v34 = vmul.f32 0.055555556, %v1684_v25  ;;  %v1199_v45 = vadd.s32 32, %v3328_v11 }
  0xe2   :  { %2641 = vmatpush.msrb.mxu1 %v2570_v24  ;;  %v2568_v54 = vmul.f32 0.00390625, %v2874_v50  ;;  %vm3490_vm1 = vmand %vm1366_vm6, %vm1446_vm7  ;;  %vm2246_vm11 = vcmp.lt.f32.partialorder %v2006_v12, 16.0  ;;  %v2005_v24 = vsub.f32 %v1605_v44, %v1925_v19 }
  0xe3   :  { %vm3506_vm5 = vmand %vm1365_vm12, %vm1445_vm13  ;;  %vm1444_vm13 = vcmp.lt.s32.totalorder %v3496_v60, 324  ;;  %v1844_v40 = vfloor.f32 %v1764_v34  ;;  %v3624_v63 = vsub.s32 %v1199_v45, %v3331_v14 }
  0xe4   :  { %2642 = vmatpush.msrb.mxu1 %v2569_v37  ;;  %vm2327_vm6 = vmand %vm2167_vm15, %vm2247_vm3  ;;  %vm1388_vm15 = vcmp.ge.s32.totalorder %v3519_v6, 0  ;;  %v3572_v37 = vsub.s32 %v1200_v30, %v3331_v14 }
  0xe5   :  { %v2873_v10 = vsel %vm2327_vm6, 1.0, %v3126_v53  ;;  %vm2166_vm7 = vmand %vm3490_vm1, %vm3498_vm4  ;;  %vm2245_vm1 = vcmp.lt.f32.partialorder %v2005_v24, 16.0  ;;  %vm1468_vm6 = vcmp.lt.s32.totalorder %v3519_v6, 324  ;;  %v1924_v49 = vmul.f32 18.0, %v1844_v40 }
  0xe6   :  { %2643 = vmatpush.msrb.mxu1 %v2568_v54  ;;  %v2567_v17 = vmul.f32 0.00390625, %v2873_v10  ;;  %vm3537_vm9 = vmand %vm1389_vm14, %vm1469_vm2  ;;  %v1603_v51 = vcvt.s32.f32 %v3572_v37 }
  0xe7   :  { %vm2165_vm12 = vmand %vm3506_vm5, %vm3529_vm8 }
  0xe8   :  { %2644 = vmatpush.msrb.mxu1 %v2567_v17  ;;  %vm2326_vm14 = vmand %vm2166_vm7, %vm2246_vm11  ;;  %vm3594_vm11 = vcmp.lt.f32.partialorder %v1844_v40, 16.0 }
  0xe9   :  { %v2872_v27 = vsel %vm2326_vm14, 1.0, %v3126_v53  ;;  %vm2325_vm4 = vmand %vm2165_vm12, %vm2245_vm1 }
  0xea   :  { %v2566_v32 = vmul.f32 0.00390625, %v2872_v27  ;;  %v2871_v39 = vsel %vm2325_vm4, 1.0, %v3126_v53  ;;  %vm3582_vm5 = vmand %vm1364_vm10, %vm1444_vm13  ;;  %vm1363_vm13 = vcmp.ge.s32.totalorder %v3572_v37, 0 }
  0xeb   :  { %vm2164_vm10 = vmand %vm3582_vm5, %vm3594_vm11  ;;  %vm1362_vm11 = vcmp.ge.s32.totalorder %v3624_v63, 0 }
  0xec   :  { %2645 = vmatpush.msrb.mxu1 %v2566_v32 }
  0xfa   :  { %v3344_v33 = vpop.f32.mrf.mxu0 }
 0x103   :  { %v151_v58 = vpop.f32.mrf.mxu0 }
 0x104   :  { %v3371_v61 = vadd.f32 %v253_v52, %v151_v58 }
 0x108   :  { %v3393_v8 = vpop.f32.mrf.mxu3  ;;  %v3395_v9 = vpop.f32.mrf.mxu2 }
 0x10b   :  { %v3422_v23 = vpop.f32.mrf.mxu0 }
 0x10c   :  { %v360_v36 = vpop.f32.mrf.mxu1  ;;  %v174_v46 = vadd.f32 %v3422_v23, %v3344_v33 }
 0x110   :  { %v131_v41 = vpop.f32.mrf.mxu3  ;;  %v193_v42 = vpop.f32.mrf.mxu2 }
 0x111   :  { %v194_v3 = vadd.f32 %v193_v42, %v3393_v8  ;;  %v1789_v8 = vmul.f32 0.055555556, %v1709_v1  ;;  %v2565_v42 = vmul.f32 0.00390625, %v2871_v39  ;;  %v1223_v1 = vadd.s32 224, %v3328_v11 }
 0x113   :  { %v233_v52 = vpop.f32.mrf.mxu0  ;;  %v1869_v22 = vfloor.f32 %v1789_v8  ;;  %2646 = vmatpush.msrb.mxu1 %v2565_v42 }
 0x114   :  { %v234_v57 = vadd.f32 %v233_v52, %v131_v41  ;;  %v1224_v41 = vadd.s32 232, %v3328_v11 }
 0x115   :  { %v472_v7 = vpop.f32.mrf.mxu1  ;;  %v1949_v28 = vmul.f32 18.0, %v1869_v22  ;;  %vm3556_vm2 = vcmp.lt.f32.partialorder %v1869_v22, 16.0  ;;  %v1198_v22 = vadd.s32 24, %v3328_v11 }
 0x116   :  { %v3511_v4 = vadd.f32 %v360_v36, %v234_v57  ;;  %vm2189_vm3 = vmand %vm3537_vm9, %vm3556_vm2  ;;  %v2004_v57 = vsub.f32 %v1604_v13, %v1924_v49  ;;  %v3616_v58 = vsub.s32 %v1224_v41, %v3331_v14  ;;  %vm1443_vm2 = vcmp.lt.s32.totalorder %v3572_v37, 324 }
 0x117   :  { %v2029_v35 = vsub.f32 %v1629_v56, %v1949_v28  ;;  %vm3607_vm9 = vmand %vm1388_vm15, %vm1468_vm6  ;;  %v3680_v34 = vsub.s32 %v1198_v22, %v3331_v14  ;;  %v1222_v37 = vadd.s32 216, %v3328_v11 }
 0x118   :  { %v213_v15 = vpop.f32.mrf.mxu3  ;;  %v3527_v16 = vpop.f32.mrf.mxu2  ;;  %vm2244_vm14 = vcmp.lt.f32.partialorder %v2004_v57, 16.0  ;;  %vm1467_vm4 = vcmp.lt.s32.totalorder %v3616_v58, 324 }
 0x119   :  { %v214_v21 = vadd.f32 %v213_v15, %v3395_v9  ;;  %v1628_v9 = vcvt.s32.f32 %v3519_v6  ;;  %vm2269_vm7 = vcmp.lt.f32.partialorder %v2029_v35, 16.0  ;;  %vm2324_vm1 = vmand %vm2164_vm10, %vm2244_vm14  ;;  %vm1442_vm10 = vcmp.lt.s32.totalorder %v3624_v63, 324 }
 0x11a   :  { %vm2349_vm8 = vmand %vm2189_vm3, %vm2269_vm7  ;;  %v2870_v10 = vsel %vm2324_vm1, 1.0, %v3126_v53  ;;  %vm1387_vm3 = vcmp.ge.s32.totalorder %v3616_v58, 0  ;;  %v1601_v49 = vcvt.s32.f32 %v3680_v34  ;;  %v3730_v23 = vsub.s32 %v1222_v37, %v3331_v14 }
 0x11b   :  { %v340_v26 = vpop.f32.mrf.mxu0  ;;  %v1708_v36 = vadd.f32 0.5, %v1628_v9  ;;  %v2895_v33 = vsel %vm2349_vm8, 1.0, %v3126_v53  ;;  %v2564_v8 = vmul.f32 0.00390625, %v2870_v10  ;;  %vm3644_vm7 = vmand %vm1363_vm13, %vm1443_vm2 }
 0x11c   :  { %v385_v31 = vadd.f32 %v340_v26, %v214_v21  ;;  %v2589_v56 = vmul.f32 0.00390625, %v2895_v33  ;;  %v3659_v21 = vsub.s32 %v1223_v1, %v3331_v14  ;;  %vm3686_vm13 = vmand %vm1387_vm3, %vm1467_vm4  ;;  %vm1361_vm4 = vcmp.ge.s32.totalorder %v3680_v34, 0 }
 0x11d   :  { %v1788_v44 = vmul.f32 0.055555556, %v1708_v36  ;;  %v584_v52 = vpop.f32.mrf.mxu1  ;;  %2647 = vmatpush.msrb.mxu1 %v2564_v8  ;;  %vm3707_vm3 = vmand %vm1362_vm11, %vm1442_vm10  ;;  %vm1441_vm10 = vcmp.lt.s32.totalorder %v3680_v34, 324 }
 0x11e   :  { %v3574_v38 = vadd.f32 %v472_v7, %v385_v31  ;;  %2658 = vmatpush.msrb.mxu2 %v2589_v56  ;;  %v1627_v7 = vcvt.s32.f32 %v3616_v58  ;;  %v1626_v32 = vcvt.s32.f32 %v3659_v21  ;;  %vm1386_vm14 = vcmp.ge.s32.totalorder %v3659_v21, 0 }
 0x11f   :  { %v1868_v55 = vfloor.f32 %v1788_v44  ;;  %vm1466_vm1 = vcmp.lt.s32.totalorder %v3659_v21, 324 }
 0x120   :  { %v320_v47 = vpop.f32.mrf.mxu3  ;;  %v380_v48 = vpop.f32.mrf.mxu2  ;;  %v1707_v15 = vadd.f32 0.5, %v1627_v7  ;;  %v1706_v41 = vadd.f32 0.5, %v1626_v32 }
 0x121   :  { %v384_v54 = vadd.f32 %v320_v47, %v194_v3  ;;  %v3600_v2 = vadd.f32 %v380_v48, %v3371_v61  ;;  %v1683_v61 = vadd.f32 0.5, %v1603_v51  ;;  %v1948_v60 = vmul.f32 18.0, %v1868_v55 }
 0x122   :  { %vm3618_vm12 = vcmp.lt.f32.partialorder %v1868_v55, 16.0  ;;  %v383_v3 = vadd.f32 %v3527_v16, %v174_v46  ;;  %v1602_v16 = vcvt.s32.f32 %v3624_v63  ;;  %v1786_v48 = vmul.f32 0.055555556, %v1706_v41 }
 0x123   :  { %v452_v59 = vpop.f32.mrf.mxu0  ;;  %vm2188_vm15 = vmand %vm3607_vm9, %vm3618_vm12  ;;  %v1763_v0 = vmul.f32 0.055555556, %v1683_v61  ;;  %v2028_v6 = vsub.f32 %v1628_v9, %v1948_v60  ;;  %v1787_v9 = vmul.f32 0.055555556, %v1707_v15  ;;  %v1197_v55 = vadd.s32 16, %v3328_v11 }
 0x124   :  { %v516_v5 = vadd.f32 %v452_v59, %v384_v54  ;;  %v1682_v29 = vadd.f32 0.5, %v1602_v16  ;;  %v1866_v61 = vfloor.f32 %v1786_v48  ;;  %v1221_v15 = vadd.s32 208, %v3328_v11 }
 0x125   :  { %v1843_v12 = vfloor.f32 %v1763_v0  ;;  %vm2268_vm6 = vcmp.lt.f32.partialorder %v2028_v6, 16.0  ;;  %v1867_v31 = vfloor.f32 %v1787_v9  ;;  %v1625_v0 = vcvt.s32.f32 %v3730_v23 }
 0x126   :  { %vm2348_vm5 = vmand %vm2188_vm15, %vm2268_vm6  ;;  %v3671_v28 = vadd.f32 %v584_v52, %v516_v5  ;;  %v1762_v36 = vmul.f32 0.055555556, %v1682_v29  ;;  %v1946_v62 = vmul.f32 18.0, %v1866_v61  ;;  %v3765_v10 = vsub.s32 %v1197_v55, %v3331_v14 }
 0x127   :  { %v1923_v18 = vmul.f32 18.0, %v1843_v12  ;;  %vm3654_vm8 = vcmp.lt.f32.partialorder %v1843_v12, 16.0  ;;  %v2894_v25 = vsel %vm2348_vm5, 1.0, %v3126_v53  ;;  %v1947_v39 = vmul.f32 18.0, %v1867_v31  ;;  %vm3725_vm5 = vmand %vm1386_vm14, %vm1466_vm1 }
 0x128   :  { %v432_v17 = vpop.f32.mrf.mxu3  ;;  %v492_v19 = vpop.f32.mrf.mxu2  ;;  %v2588_v26 = vmul.f32 0.00390625, %v2894_v25  ;;  %vm2163_vm9 = vmand %vm3644_vm7, %vm3654_vm8  ;;  %vm3697_vm2 = vcmp.lt.f32.partialorder %v1867_v31, 16.0  ;;  %v1842_v45 = vfloor.f32 %v1762_v36  ;;  %vm3749_vm14 = vcmp.lt.f32.partialorder %v1866_v61, 16.0 }
 0x129   :  { %v3663_v24 = vadd.f32 %v492_v19, %v3511_v4  ;;  %v2003_v27 = vsub.f32 %v1603_v51, %v1923_v18  ;;  %v515_v42 = vadd.f32 %v432_v17, %v383_v3  ;;  %v2027_v47 = vsub.f32 %v1627_v7, %v1947_v39  ;;  %vm2187_vm6 = vmand %vm3686_vm13, %vm3697_vm2 }
 0x12a   :  { %2659 = vmatpush.msrb.mxu2 %v2588_v26  ;;  %v1922_v52 = vmul.f32 18.0, %v1842_v45  ;;  %vm3717_vm7 = vcmp.lt.f32.partialorder %v1842_v45, 16.0  ;;  %v2026_v6 = vsub.f32 %v1626_v32, %v1946_v62  ;;  %vm1465_vm1 = vcmp.lt.s32.totalorder %v3730_v23, 324 }
 0x12b   :  { %v3673_v30 = vpop.f32.mrf.mxu0  ;;  %v3675_v4 = vpop.f32.mrf.mxu1  ;;  %vm2243_vm12 = vcmp.lt.f32.partialorder %v2003_v27, 16.0  ;;  %vm2267_vm8 = vcmp.lt.f32.partialorder %v2027_v47, 16.0  ;;  %vm2162_vm11 = vmand %vm3707_vm3, %vm3717_vm7  ;;  %v1705_v7 = vadd.f32 0.5, %v1625_v0  ;;  %v1196_v18 = vadd.s32 8, %v3328_v11 }
 0x12c   :  { %vm2323_vm15 = vmand %vm2163_vm9, %vm2243_vm12  ;;  %v2002_v58 = vsub.f32 %v1602_v16, %v1922_v52  ;;  %vm1385_vm12 = vcmp.ge.s32.totalorder %v3730_v23, 0  ;;  %v3781_v20 = vadd.f32 %v3673_v30, %v515_v42  ;;  %v1600_v9 = vcvt.s32.f32 %v3765_v10 }
 0x12d   :  { %v2869_v43 = vsel %vm2323_vm15, 1.0, %v3126_v53  ;;  %vm2347_vm9 = vmand %vm2187_vm6, %vm2267_vm8  ;;  %vm2266_vm6 = vcmp.lt.f32.partialorder %v2026_v6, 16.0  ;;  %v1785_v19 = vmul.f32 0.055555556, %v1705_v7  ;;  %v3809_v34 = vsub.s32 %v1221_v15, %v3331_v14 }
 0x12e   :  { %v2563_v46 = vmul.f32 0.00390625, %v2869_v43  ;;  %v2893_v60 = vsel %vm2347_vm9, 1.0, %v3126_v53  ;;  %vm2242_vm13 = vcmp.lt.f32.partialorder %v2002_v58, 16.0  ;;  %vm2186_vm15 = vmand %vm3725_vm5, %vm3749_vm14  ;;  %vm1360_vm5 = vcmp.ge.s32.totalorder %v3765_v10, 0 }
 0x12f   :  { %v2587_v3 = vmul.f32 0.00390625, %v2893_v60  ;;  %vm2322_vm2 = vmand %vm2162_vm11, %vm2242_vm13  ;;  %v1865_v30 = vfloor.f32 %v1785_v19  ;;  %v3817_v39 = vsub.s32 %v1196_v18, %v3331_v14  ;;  %v1220_v42 = vadd.s32 200, %v3328_v11 }
 0x130   :  { %v512_v50 = vpop.f32.mrf.mxu3  ;;  %v604_v51 = vpop.f32.mrf.mxu2  ;;  %2648 = vmatpush.msrb.mxu1 %v2563_v46  ;;  %v2868_v8 = vsel %vm2322_vm2, 1.0, %v3126_v53  ;;  %vm3775_vm3 = vmand %vm1361_vm4, %vm1441_vm10  ;;  %vm1440_vm10 = vcmp.lt.s32.totalorder %v3765_v10, 324  ;;  %vm1464_vm2 = vcmp.lt.s32.totalorder %v3809_v34, 324  ;;  %v1624_v45 = vcvt.s32.f32 %v3809_v34 }
 0x131   :  { %v519_v56 = vadd.f32 %v512_v50, %v3600_v2  ;;  %v3735_v57 = vadd.f32 %v604_v51, %v3574_v38  ;;  %v1681_v2 = vadd.f32 0.5, %v1601_v49  ;;  %2660 = vmatpush.msrb.mxu2 %v2587_v3  ;;  %v2562_v16 = vmul.f32 0.00390625, %v2868_v8  ;;  %vm2346_vm7 = vmand %vm2186_vm15, %vm2266_vm6 }
 0x132   :  { %v2892_v27 = vsel %vm2346_vm7, 1.0, %v3126_v53  ;;  %vm3799_vm4 = vmand %vm1385_vm12, %vm1465_vm1  ;;  %v1945_v36 = vmul.f32 18.0, %v1865_v30  ;;  %vm3811_vm9 = vcmp.lt.f32.partialorder %v1865_v30, 16.0  ;;  %vm1384_vm15 = vcmp.ge.s32.totalorder %v3809_v34, 0 }
 0x133   :  { %v644_v38 = vpop.f32.mrf.mxu0  ;;  %v776_v59 = vpop.f32.mrf.mxu1  ;;  %v1761_v5 = vmul.f32 0.055555556, %v1681_v2  ;;  %2649 = vmatpush.msrb.mxu1 %v2562_v16  ;;  %v2586_v31 = vmul.f32 0.00390625, %v2892_v27  ;;  %vm2185_vm14 = vmand %vm3799_vm4, %vm3811_vm9  ;;  %vm1359_vm1 = vcmp.ge.s32.totalorder %v3817_v39, 0  ;;  %v1704_v51 = vadd.f32 0.5, %v1624_v45 }
 0x134   :  { %v651_v1 = vadd.f32 %v644_v38, %v519_v56  ;;  %v2025_v44 = vsub.f32 %v1625_v0, %v1945_v36  ;;  %v1599_v52 = vcvt.s32.f32 %v3817_v39  ;;  %v3855_v55 = vsub.s32 %v1220_v42, %v3331_v14 }
 0x135   :  { %v1841_v13 = vfloor.f32 %v1761_v5  ;;  %2661 = vmatpush.msrb.mxu2 %v2586_v31  ;;  %v1242_v56 = vadd.s32 376, %v3328_v11  ;;  %v1784_v58 = vmul.f32 0.055555556, %v1704_v51  ;;  %v3881_v5 = vsub.s32 %v3328_v11, %v3331_v14 }
 0x136   :  { %v3767_v12 = vadd.f32 %v776_v59, %v651_v1  ;;  %vm2265_vm6 = vcmp.lt.f32.partialorder %v2025_v44, 16.0  ;;  %v1679_v2 = vadd.f32 0.5, %v1599_v52  ;;  %vm1463_vm9 = vcmp.lt.s32.totalorder %v3855_v55, 324 }
 0x137   :  { %v1921_v22 = vmul.f32 18.0, %v1841_v13  ;;  %vm3788_vm8 = vcmp.lt.f32.partialorder %v1841_v13, 16.0  ;;  %vm2345_vm7 = vmand %vm2185_vm14, %vm2265_vm6  ;;  %v1864_v62 = vfloor.f32 %v1784_v58  ;;  %v1623_v0 = vcvt.s32.f32 %v3855_v55 }
 0x138   :  { %v624_v21 = vpop.f32.mrf.mxu3  ;;  %vm2161_vm11 = vmand %vm3775_vm3, %vm3788_vm8  ;;  %v2891_v61 = vsel %vm2345_vm7, 1.0, %v3126_v53  ;;  %v1759_v63 = vmul.f32 0.055555556, %v1679_v2  ;;  %v3877_v3 = vsub.s32 %v1242_v56, %v3331_v14  ;;  %v1598_v27 = vcvt.s32.f32 %v3881_v5 }
 0x139   :  { %v650_v26 = vadd.f32 %v624_v21, %v3663_v24  ;;  %v2001_v32 = vsub.f32 %v1601_v49, %v1921_v22  ;;  %v1680_v24 = vadd.f32 0.5, %v1600_v9  ;;  %vm3840_vm3 = vmand %vm1360_vm5, %vm1440_vm10  ;;  %v2585_v59 = vmul.f32 0.00390625, %v2891_v61 }
 0x13a   :  { %vm1439_vm5 = vcmp.lt.s32.totalorder %v3817_v39, 324  ;;  %v1944_v7 = vmul.f32 18.0, %v1864_v62  ;;  %v1839_v8 = vfloor.f32 %v1759_v63  ;;  %v1703_v13 = vadd.f32 0.5, %v1623_v0 }
 0x13b   :  { %v756_v35 = vpop.f32.mrf.mxu0  ;;  %vm2241_vm12 = vcmp.lt.f32.partialorder %v2001_v32, 16.0  ;;  %v1760_v41 = vmul.f32 0.055555556, %v1680_v24  ;;  %v888_v43 = vpop.f32.mrf.mxu1  ;;  %2662 = vmatpush.msrb.mxu2 %v2585_v59  ;;  %vm1485_vm6 = vcmp.lt.s32.totalorder %v3877_v3, 324  ;;  %v1645_v17 = vcvt.s32.f32 %v3877_v3 }
 0x13c   :  { %v782_v40 = vadd.f32 %v756_v35, %v650_v26  ;;  %vm2321_vm13 = vmand %vm2161_vm11, %vm2241_vm12  ;;  %vm1383_vm11 = vcmp.ge.s32.totalorder %v3855_v55, 0  ;;  %v2024_v18 = vsub.f32 %v1624_v45, %v1944_v7  ;;  %v1919_v21 = vmul.f32 18.0, %v1839_v8 }
 0x13d   :  { %v2867_v47 = vsel %vm2321_vm13, 1.0, %v3126_v53  ;;  %v1840_v48 = vfloor.f32 %v1760_v41  ;;  %vm3872_vm12 = vmand %vm1384_vm15, %vm1464_vm2  ;;  %vm3883_vm13 = vcmp.lt.f32.partialorder %v1864_v62, 16.0  ;;  %vm1405_vm2 = vcmp.ge.s32.totalorder %v3877_v3, 0 }
 0x13e   :  { %v3832_v46 = vadd.f32 %v888_v43, %v782_v40  ;;  %v2561_v49 = vmul.f32 0.00390625, %v2867_v47  ;;  %vm3892_vm15 = vmand %vm1359_vm1, %vm1439_vm5  ;;  %vm3903_vm7 = vcmp.lt.f32.partialorder %v1839_v8, 16.0  ;;  %v1783_v25 = vmul.f32 0.055555556, %v1703_v13 }
 0x13f   :  { %v1920_v54 = vmul.f32 18.0, %v1840_v48  ;;  %vm3850_vm8 = vcmp.lt.f32.partialorder %v1840_v48, 16.0  ;;  %vm1358_vm1 = vcmp.ge.s32.totalorder %v3881_v5, 0  ;;  %v1999_v26 = vsub.f32 %v1599_v52, %v1919_v21  ;;  %vm2159_vm5 = vmand %vm3892_vm15, %vm3903_vm7 }
 0x140   :  { %v736_v23 = vpop.f32.mrf.mxu3  ;;  %2650 = vmatpush.msrb.mxu1 %v2561_v49  ;;  %vm2160_vm4 = vmand %vm3840_vm3, %vm3850_vm8  ;;  %vm1438_vm8 = vcmp.lt.s32.totalorder %v3881_v5, 324  ;;  %v1219_v29 = vadd.s32 192, %v3328_v11  ;;  %v1863_v30 = vfloor.f32 %v1783_v25  ;;  %v1241_v32 = vadd.s32 368, %v3328_v11 }
 0x141   :  { %v781_v38 = vadd.f32 %v736_v23, %v3735_v57  ;;  %v2000_v60 = vsub.f32 %v1600_v9, %v1920_v54  ;;  %vm2184_vm3 = vmand %vm3872_vm12, %vm3883_vm13  ;;  %v1725_v9 = vadd.f32 0.5, %v1645_v17  ;;  %v1274_v24 = vadd.s32 632, %v3328_v11 }
 0x142   :  { %vm2239_vm12 = vcmp.lt.f32.partialorder %v1999_v26, 16.0  ;;  %v1678_v36 = vadd.f32 0.5, %v1598_v27  ;;  %v3927_v37 = vsub.s32 %v1219_v29, %v3331_v14  ;;  %v1943_v40 = vmul.f32 18.0, %v1863_v30 }
 0x143   :  { %v868_v1 = vpop.f32.mrf.mxu0  ;;  %vm2240_vm10 = vcmp.lt.f32.partialorder %v2000_v60, 16.0  ;;  %v1805_v31 = vmul.f32 0.055555556, %v1725_v9  ;;  %vm2319_vm13 = vmand %vm2159_vm5, %vm2239_vm12  ;;  %vm3929_vm15 = vcmp.lt.f32.partialorder %v1863_v30, 16.0  ;;  %v3962_v23 = vsub.s32 %v1241_v32, %v3331_v14 }
 0x144   :  { %v913_v6 = vadd.f32 %v868_v1, %v781_v38  ;;  %vm2320_vm14 = vmand %vm2160_vm4, %vm2240_vm10  ;;  %vm2264_vm4 = vcmp.lt.f32.partialorder %v2024_v18, 16.0  ;;  %v2865_v43 = vsel %vm2319_vm13, 1.0, %v3126_v53  ;;  %v1758_v45 = vmul.f32 0.055555556, %v1678_v36  ;;  %v1000_v47 = vpop.f32.mrf.mxu1 }
 0x145   :  { %v2866_v15 = vsel %vm2320_vm14, 1.0, %v3126_v53  ;;  %vm2344_vm10 = vmand %vm2184_vm3, %vm2264_vm4  ;;  %v1885_v42 = vfloor.f32 %v1805_v31  ;;  %vm1462_vm3 = vcmp.lt.s32.totalorder %v3927_v37, 324  ;;  %v2559_v48 = vmul.f32 0.00390625, %v2865_v43 }
 0x146   :  { %v2560_v19 = vmul.f32 0.00390625, %v2866_v15  ;;  %v2890_v34 = vsel %vm2344_vm10, 1.0, %v3126_v53  ;;  %vm3922_vm14 = vmand %vm1383_vm11, %vm1463_vm9  ;;  %vm1382_vm9 = vcmp.ge.s32.totalorder %v3927_v37, 0  ;;  %v2023_v49 = vsub.f32 %v1623_v0, %v1943_v40 }
 0x147   :  { %v2584_v39 = vmul.f32 0.00390625, %v2890_v34  ;;  %vm3938_vm11 = vmand %vm1405_vm2, %vm1485_vm6  ;;  %v1965_v50 = vmul.f32 18.0, %v1885_v42  ;;  %vm3948_vm4 = vcmp.lt.f32.partialorder %v1885_v42, 16.0  ;;  %v1838_v54 = vfloor.f32 %v1758_v45 }
 0x148   :  { %2651 = vmatpush.msrb.mxu1 %v2560_v19  ;;  %vm2183_vm7 = vmand %vm3922_vm14, %vm3929_vm15  ;;  %v1622_v33 = vcvt.s32.f32 %v3927_v37  ;;  %v3965_v55 = vsub.s32 %v1274_v24, %v3331_v14  ;;  %vm2263_vm6 = vcmp.lt.f32.partialorder %v2023_v49, 16.0  ;;  %v3971_v61 = vadd.f32 %v1000_v47, %v913_v6  ;;  %v716_v49 = vpop.f32.mrf.mxu2 }
 0x149   :  { %2663 = vmatpush.msrb.mxu2 %v2584_v39  ;;  %vm3956_vm2 = vmand %vm1358_vm1, %vm1438_vm8  ;;  %v2045_v56 = vsub.f32 %v1645_v17, %v1965_v50  ;;  %v1218_v58 = vadd.s32 184, %v3328_v11  ;;  %v1918_v2 = vmul.f32 18.0, %v1838_v54  ;;  %vm3974_vm5 = vcmp.lt.f32.partialorder %v1838_v54, 16.0 }
 0x14a   :  { %2652 = vmatpush.msrb.mxu1 %v2559_v48  ;;  %vm2205_vm1 = vmand %vm3938_vm11, %vm3948_vm4  ;;  %v1702_v59 = vadd.f32 0.5, %v1622_v33  ;;  %vm1404_vm10 = vcmp.ge.s32.totalorder %v3962_v23, 0  ;;  %vm1484_vm13 = vcmp.lt.s32.totalorder %v3962_v23, 324  ;;  %v1644_v62 = vcvt.s32.f32 %v3962_v23 }
 0x14b   :  { %vm2343_vm8 = vmand %vm2183_vm7, %vm2263_vm6  ;;  %vm2285_vm12 = vcmp.lt.f32.partialorder %v2045_v56, 16.0  ;;  %v1998_v0 = vsub.f32 %v1598_v27, %v1918_v2  ;;  %vm1437_vm11 = vcmp.ge.s32.totalorder %v3965_v55, 0  ;;  %vm1517_vm7 = vcmp.lt.s32.totalorder %v3965_v55, 324 }
 0x14c   :  { %v2889_v60 = vsel %vm2343_vm8, 1.0, %v3126_v53  ;;  %vm2158_vm14 = vmand %vm3956_vm2, %vm3974_vm5  ;;  %v1782_v1 = vmul.f32 0.055555556, %v1702_v59  ;;  %v1724_v3 = vadd.f32 0.5, %v1644_v62  ;;  %v1677_v5 = vcvt.s32.f32 %v3965_v55 }
 0x14d   :  { %v2583_v63 = vmul.f32 0.00390625, %v2889_v60  ;;  %vm2365_vm15 = vmand %vm2205_vm1, %vm2285_vm12  ;;  %vm2238_vm4 = vcmp.lt.f32.partialorder %v1998_v0, 16.0  ;;  %v3999_v8 = vsub.s32 %v1218_v58, %v3331_v14  ;;  %v1240_v16 = vadd.s32 360, %v3328_v11 }
 0x14e   :  { %v2911_v57 = vsel %vm2365_vm15, 1.0, %v3126_v53  ;;  %vm3994_vm6 = vmand %vm1382_vm9, %vm1462_vm3  ;;  %v1862_v10 = vfloor.f32 %v1782_v1  ;;  %v1804_v13 = vmul.f32 0.055555556, %v1724_v3  ;;  %v1757_v15 = vadd.f32 0.5, %v1677_v5 }
 0x14f   :  { %2664 = vmatpush.msrb.mxu2 %v2583_v63  ;;  %v2605_v6 = vmul.f32 0.00390625, %v2911_v57  ;;  %vm2318_vm1 = vmand %vm2158_vm14, %vm2238_vm4  ;;  %v1273_v17 = vadd.s32 624, %v3328_v11  ;;  %vm1381_vm3 = vcmp.ge.s32.totalorder %v3999_v8, 0  ;;  %vm1461_vm8 = vcmp.lt.s32.totalorder %v3999_v8, 324 }
 0x150   :  { %v2864_v19 = vsel %vm2318_vm1, 1.0, %v3126_v53  ;;  %v1942_v18 = vmul.f32 18.0, %v1862_v10  ;;  %vm4009_vm9 = vcmp.lt.f32.partialorder %v1862_v10, 16.0  ;;  %vm4018_vm2 = vmand %vm1404_vm10, %vm1484_vm13  ;;  %v1884_v9 = vfloor.f32 %v1804_v13 }
 0x151   :  { %2678 = vmatpush.msra.mxu3 %v2605_v6  ;;  %v2558_v22 = vmul.f32 0.00390625, %v2864_v19  ;;  %v1837_v26 = vmul.f32 0.055555556, %v1757_v15  ;;  %vm2182_vm5 = vmand %vm3994_vm6, %vm4009_vm9  ;;  %v1621_v29 = vcvt.s32.f32 %v3999_v8  ;;  %v4029_v30 = vsub.s32 %v1240_v16, %v3331_v14 }
 0x152   :  { %v2022_v27 = vsub.f32 %v1622_v33, %v1942_v18  ;;  %v4032_v31 = vsub.s32 %v1273_v17, %v3331_v14  ;;  %v1964_v32 = vmul.f32 18.0, %v1884_v9  ;;  %vm4034_vm10 = vcmp.lt.f32.partialorder %v1884_v9, 16.0  ;;  %vm4042_vm12 = vmand %vm1437_vm11, %vm1517_vm7 }
 0x153   :  { %2653 = vmatpush.msrb.mxu1 %v2558_v22  ;;  %v1917_v35 = vfloor.f32 %v1837_v26  ;;  %v1217_v36 = vadd.s32 176, %v3328_v11  ;;  %vm2204_vm13 = vmand %vm4018_vm2, %vm4034_vm10  ;;  %v1701_v37 = vadd.f32 0.5, %v1621_v29  ;;  %vm1483_vm4 = vcmp.lt.s32.totalorder %v4029_v30, 324 }
 0x154   :  { %vm2262_vm14 = vcmp.lt.f32.partialorder %v2022_v27, 16.0  ;;  %v2044_v39 = vsub.f32 %v1644_v62, %v1964_v32  ;;  %v1643_v42 = vcvt.s32.f32 %v4029_v30  ;;  %vm1436_vm1 = vcmp.ge.s32.totalorder %v4032_v31, 0 }
 0x155   :  { %vm2342_vm11 = vmand %vm2182_vm5, %vm2262_vm14  ;;  %v1997_v40 = vmul.f32 18.0, %v1917_v35  ;;  %vm4058_vm7 = vcmp.lt.f32.partialorder %v1917_v35, 16.0  ;;  %v1781_v44 = vmul.f32 0.055555556, %v1701_v37  ;;  %vm1516_vm0 = vcmp.lt.s32.totalorder %v4032_v31, 324 }
 0x156   :  { %v2888_v43 = vsel %vm2342_vm11, 1.0, %v3126_v53  ;;  %vm2284_vm15 = vcmp.lt.f32.partialorder %v2044_v39, 16.0  ;;  %vm2237_vm6 = vmand %vm4042_vm12, %vm4058_vm7  ;;  %v1723_v48 = vadd.f32 0.5, %v1643_v42  ;;  %v1676_v51 = vcvt.s32.f32 %v4032_v31 }
 0x157   :  { %v2582_v45 = vmul.f32 0.00390625, %v2888_v43  ;;  %v2077_v47 = vsub.f32 %v1677_v5, %v1997_v40  ;;  %vm2364_vm9 = vmand %vm2204_vm13, %vm2284_vm15  ;;  %v1861_v50 = vfloor.f32 %v1781_v44  ;;  %v4077_v52 = vsub.s32 %v1217_v36, %v3331_v14  ;;  %v848_v40 = vpop.f32.mrf.mxu3 }
 0x158   :  { %v1239_v54 = vadd.s32 352, %v3328_v11  ;;  %v2910_v33 = vsel %vm2364_vm9, 1.0, %v3126_v53  ;;  %vm4085_vm14 = vmand %vm1381_vm3, %vm1461_vm8  ;;  %v1803_v55 = vmul.f32 0.055555556, %v1723_v48  ;;  %v1272_v56 = vadd.s32 616, %v3328_v11 }
 0x159   :  { %2665 = vmatpush.msrb.mxu2 %v2582_v45  ;;  %vm2317_vm5 = vcmp.lt.f32.partialorder %v2077_v47, 16.0  ;;  %v2604_v58 = vmul.f32 0.00390625, %v2910_v33  ;;  %v1941_v2 = vmul.f32 18.0, %v1861_v50  ;;  %vm4095_vm10 = vcmp.lt.f32.partialorder %v1861_v50, 16.0  ;;  %vm4128_vm15 = vmand %vm1436_vm1, %vm1516_vm0 }
 0x15a   :  { %vm2397_vm2 = vmand %vm2237_vm6, %vm2317_vm5  ;;  %v1756_v59 = vadd.f32 0.5, %v1676_v51  ;;  %v4101_v60 = vadd.f32 %v3675_v4, %v3781_v20  ;;  %v4104_v62 = vadd.f32 %v716_v49, %v3671_v28  ;;  %vm5549_vm3 = vcmp.ge.s32.totalorder %v4029_v30, 0 }
 0x15b   :  { %v2943_v63 = vsel %vm2397_vm2, 1.0, %v3126_v53  ;;  %vm4111_vm8 = vmand %vm5549_vm3, %vm1483_vm4  ;;  %v1883_v1 = vfloor.f32 %v1803_v55  ;;  %2679 = vmatpush.msra.mxu3 %v2604_v58  ;;  %v2021_v3 = vsub.f32 %v1621_v29, %v1941_v2  ;;  %v1620_v4 = vcvt.s32.f32 %v4077_v52 }
 0x15c   :  { %v2637_v57 = vmul.f32 0.00390625, %v2943_v63  ;;  %vm2181_vm12 = vmand %vm4085_vm14, %vm4095_vm10  ;;  %v1836_v28 = vmul.f32 0.055555556, %v1756_v59  ;;  %vm1380_vm4 = vcmp.ge.s32.totalorder %v4077_v52, 0  ;;  %v1322_v7 = vsub.s32 %v1239_v54, %v3331_v14 }
 0x15d   :  { %v1963_v20 = vmul.f32 18.0, %v1883_v1  ;;  %vm4120_vm13 = vcmp.lt.f32.partialorder %v1883_v1, 16.0  ;;  %vm2261_vm11 = vcmp.lt.f32.partialorder %v2021_v3, 16.0  ;;  %v1700_v8 = vadd.f32 0.5, %v1620_v4 }
 0x15e   :  { %2718 = vmatpush.msra.mxu1 %v2637_v57  ;;  %vm2203_vm7 = vmand %vm4111_vm8, %vm4120_vm13  ;;  %v1916_v10 = vfloor.f32 %v1836_v28  ;;  %v4139_v13 = vsub.s32 %v1272_v56, %v3331_v14  ;;  %vm1460_vm1 = vcmp.lt.s32.totalorder %v4077_v52, 324  ;;  %vm1402_vm6 = vcmp.ge.s32.totalorder %v1322_v7, 0 }
 0x15f   :  { %vm2341_vm0 = vmand %vm2181_vm12, %vm2261_vm11  ;;  %v2043_v15 = vsub.f32 %v1643_v42, %v1963_v20  ;;  %v1642_v16 = vcvt.s32.f32 %v1322_v7  ;;  %v1780_v21 = vmul.f32 0.055555556, %v1700_v8  ;;  %vm1482_vm2 = vcmp.lt.s32.totalorder %v1322_v7, 324 }
 0x160   :  { %v2887_v17 = vsel %vm2341_vm0, 1.0, %v3126_v53  ;;  %v1996_v19 = vmul.f32 18.0, %v1916_v10  ;;  %vm4143_vm9 = vcmp.lt.f32.partialorder %v1916_v10, 16.0  ;;  %vm1435_vm3 = vcmp.ge.s32.totalorder %v4139_v13, 0  ;;  %vm4163_vm12 = vmand %vm1380_vm4, %vm1460_vm1 }
 0x161   :  { %v2581_v22 = vmul.f32 0.00390625, %v2887_v17  ;;  %vm2283_vm5 = vcmp.lt.f32.partialorder %v2043_v15, 16.0  ;;  %vm2236_vm14 = vmand %vm4128_vm15, %vm4143_vm9  ;;  %v1722_v25 = vadd.f32 0.5, %v1642_v16  ;;  %v1860_v26 = vfloor.f32 %v1780_v21 }
 0x162   :  { %vm2363_vm10 = vmand %vm2203_vm7, %vm2283_vm5  ;;  %v2076_v9 = vsub.f32 %v1676_v51, %v1996_v19  ;;  %v1675_v27 = vcvt.s32.f32 %v4139_v13  ;;  %vm1515_vm8 = vcmp.lt.s32.totalorder %v4139_v13, 324  ;;  %v1216_v32 = vadd.s32 168, %v3328_v11 }
 0x163   :  { %2666 = vmatpush.msrb.mxu2 %v2581_v22  ;;  %v2909_v29 = vsel %vm2363_vm10, 1.0, %v3126_v53  ;;  %v1802_v31 = vmul.f32 0.055555556, %v1722_v25  ;;  %v1940_v34 = vmul.f32 18.0, %v1860_v26  ;;  %vm4169_vm11 = vcmp.lt.f32.partialorder %v1860_v26, 16.0  ;;  %vm4175_vm7 = vmand %vm1402_vm6, %vm1482_vm2 }
 0x164   :  { %v2603_v24 = vmul.f32 0.00390625, %v2909_v29  ;;  %vm2316_vm13 = vcmp.lt.f32.partialorder %v2076_v9, 16.0  ;;  %v1755_v39 = vadd.f32 0.5, %v1675_v27  ;;  %v4185_v41 = vsub.s32 %v1216_v32, %v3331_v14  ;;  %vm2180_vm0 = vmand %vm4163_vm12, %vm4169_vm11 }
 0x165   :  { %vm2396_vm4 = vmand %vm2236_vm14, %vm2316_vm13  ;;  %v1882_v37 = vfloor.f32 %v1802_v31  ;;  %v1238_v42 = vadd.s32 344, %v3328_v11  ;;  %v2020_v44 = vsub.f32 %v1620_v4, %v1940_v34  ;;  %v1258_v45 = vadd.s32 504, %v3328_v11 }
 0x166   :  { %2680 = vmatpush.msra.mxu3 %v2603_v24  ;;  %v2942_v43 = vsel %vm2396_vm4, 1.0, %v3126_v53  ;;  %v1271_v47 = vadd.s32 608, %v3328_v11  ;;  %v1835_v51 = vmul.f32 0.055555556, %v1755_v39  ;;  %v4204_v52 = vadd.f32 %v848_v40, %v4104_v62  ;;  %vm4217_vm2 = vmand %vm1435_vm3, %vm1515_vm8  ;;  %v980_v40 = vpop.f32.mrf.mxu0 }
 0x167   :  { %v2636_v48 = vmul.f32 0.00390625, %v2942_v43  ;;  %v1962_v49 = vmul.f32 18.0, %v1882_v37  ;;  %vm4195_vm15 = vcmp.lt.f32.partialorder %v1882_v37, 16.0  ;;  %vm2260_vm1 = vcmp.lt.f32.partialorder %v2020_v44, 16.0 }
 0x168   :  { %vm2202_vm6 = vmand %vm4175_vm7, %vm4195_vm15  ;;  %vm1379_vm9 = vcmp.ge.s32.totalorder %v4185_v41, 0  ;;  %v1619_v54 = vcvt.s32.f32 %v4185_v41  ;;  %v1915_v23 = vfloor.f32 %v1835_v51  ;;  %vm1459_vm14 = vcmp.lt.s32.totalorder %v4185_v41, 324 }
 0x169   :  { %2719 = vmatpush.msra.mxu1 %v2636_v48  ;;  %vm2340_vm5 = vmand %vm2180_vm0, %vm2260_vm1  ;;  %v2042_v33 = vsub.f32 %v1642_v16, %v1962_v49  ;;  %v4210_v55 = vsub.s32 %v1238_v42, %v3331_v14  ;;  %v4222_v38 = vsub.s32 %v1258_v45, %v3331_v14  ;;  %v4225_v59 = vsub.s32 %v1271_v47, %v3331_v14 }
 0x16a   :  { %v2886_v56 = vsel %vm2340_vm5, 1.0, %v3126_v53  ;;  %v1699_v2 = vadd.f32 0.5, %v1619_v54  ;;  %v1995_v63 = vmul.f32 18.0, %v1915_v23  ;;  %vm4227_vm12 = vcmp.lt.f32.partialorder %v1915_v23, 16.0  ;;  %vm4251_vm15 = vmand %vm1379_vm9, %vm1459_vm14 }
 0x16b   :  { %v2580_v62 = vmul.f32 0.00390625, %v2886_v56  ;;  %vm2282_vm10 = vcmp.lt.f32.partialorder %v2042_v33, 16.0  ;;  %vm1401_vm8 = vcmp.ge.s32.totalorder %v4210_v55, 0  ;;  %vm1481_vm13 = vcmp.lt.s32.totalorder %v4210_v55, 324  ;;  %vm2235_vm11 = vmand %vm4217_vm2, %vm4227_vm12 }
 0x16c   :  { %vm2362_vm3 = vmand %vm2202_vm6, %vm2282_vm10  ;;  %v1779_v1 = vmul.f32 0.055555556, %v1699_v2  ;;  %v1641_v57 = vcvt.s32.f32 %v4210_v55  ;;  %v2075_v28 = vsub.f32 %v1675_v27, %v1995_v63  ;;  %vm1421_vm4 = vcmp.ge.s32.totalorder %v4222_v38, 0 }
 0x16d   :  { %2667 = vmatpush.msrb.mxu2 %v2580_v62  ;;  %v2908_v3 = vsel %vm2362_vm3, 1.0, %v3126_v53  ;;  %vm1501_vm7 = vcmp.lt.s32.totalorder %v4222_v38, 324  ;;  %v1661_v6 = vcvt.s32.f32 %v4222_v38  ;;  %vm1434_vm1 = vcmp.ge.s32.totalorder %v4225_v59, 0  ;;  %vm4267_vm9 = vmand %vm1401_vm8, %vm1481_vm13 }
 0x16e   :  { %v2602_v4 = vmul.f32 0.00390625, %v2908_v3  ;;  %v1859_v20 = vfloor.f32 %v1779_v1  ;;  %v1721_v5 = vadd.f32 0.5, %v1641_v57  ;;  %vm2315_vm0 = vcmp.lt.f32.partialorder %v2075_v28, 16.0  ;;  %vm4281_vm10 = vmand %vm1421_vm4, %vm1501_vm7 }
 0x16f   :  { %vm1514_vm6 = vcmp.lt.s32.totalorder %v4225_v59, 324  ;;  %v1674_v10 = vcvt.s32.f32 %v4225_v59  ;;  %vm2395_vm5 = vmand %vm2235_vm11, %vm2315_vm0  ;;  %v1741_v16 = vadd.f32 0.5, %v1661_v6  ;;  %v1215_v21 = vadd.s32 160, %v3328_v11 }
 0x170   :  { %2681 = vmatpush.msra.mxu3 %v2602_v4  ;;  %v1939_v8 = vmul.f32 18.0, %v1859_v20  ;;  %vm4258_vm2 = vcmp.lt.f32.partialorder %v1859_v20, 16.0  ;;  %v1801_v15 = vmul.f32 0.055555556, %v1721_v5  ;;  %v2941_v17 = vsel %vm2395_vm5, 1.0, %v3126_v53  ;;  %vm4298_vm8 = vmand %vm1434_vm1, %vm1514_vm6 }
 0x171   :  { %v1754_v18 = vadd.f32 0.5, %v1674_v10  ;;  %v1237_v22 = vadd.s32 336, %v3328_v11  ;;  %v2635_v25 = vmul.f32 0.00390625, %v2941_v17  ;;  %vm2179_vm14 = vmand %vm4251_vm15, %vm4258_vm2  ;;  %v1821_v27 = vmul.f32 0.055555556, %v1741_v16 }
 0x172   :  { %v2019_v9 = vsub.f32 %v1619_v54, %v1939_v8  ;;  %v1881_v26 = vfloor.f32 %v1801_v15  ;;  %v1298_v31 = vsub.s32 %v1215_v21, %v3331_v14  ;;  %v1257_v24 = vadd.s32 496, %v3328_v11 }
 0x173   :  { %v1834_v30 = vmul.f32 0.055555556, %v1754_v18  ;;  %v4287_v32 = vsub.s32 %v1237_v22, %v3331_v14  ;;  %2720 = vmatpush.msra.mxu1 %v2635_v25  ;;  %v1901_v36 = vfloor.f32 %v1821_v27  ;;  %v4324_v54 = vadd.f32 %v980_v40, %v4204_v52 }
 0x174   :  { %vm2259_vm12 = vcmp.lt.f32.partialorder %v2019_v9, 16.0  ;;  %v1961_v34 = vmul.f32 18.0, %v1881_v26  ;;  %vm4290_vm3 = vcmp.lt.f32.partialorder %v1881_v26, 16.0  ;;  %vm1378_vm11 = vcmp.ge.s32.totalorder %v1298_v31, 0 }
 0x175   :  { %vm2339_vm13 = vmand %vm2179_vm14, %vm2259_vm12  ;;  %v1914_v39 = vfloor.f32 %v1834_v30  ;;  %vm1458_vm4 = vcmp.lt.s32.totalorder %v1298_v31, 324  ;;  %v1618_v41 = vcvt.s32.f32 %v1298_v31  ;;  %v1981_v44 = vmul.f32 18.0, %v1901_v36 }
 0x176   :  { %v2885_v42 = vsel %vm2339_vm13, 1.0, %v3126_v53  ;;  %v2041_v43 = vsub.f32 %v1641_v57, %v1961_v34  ;;  %vm2201_vm7 = vmand %vm4267_vm9, %vm4290_vm3  ;;  %vm4307_vm0 = vcmp.lt.f32.partialorder %v1901_v36, 16.0  ;;  %vm1400_vm2 = vcmp.ge.s32.totalorder %v4287_v32, 0 }
 0x177   :  { %v2579_v47 = vmul.f32 0.00390625, %v2885_v42  ;;  %vm2221_vm15 = vmand %vm4281_vm10, %vm4307_vm0  ;;  %v1994_v48 = vmul.f32 18.0, %v1914_v39  ;;  %vm4315_vm1 = vcmp.lt.f32.partialorder %v1914_v39, 16.0  ;;  %v1698_v50 = vadd.f32 0.5, %v1618_v41 }
 0x178   :  { %vm2281_vm6 = vcmp.lt.f32.partialorder %v2041_v43, 16.0  ;;  %v2061_v51 = vsub.f32 %v1661_v6, %v1981_v44  ;;  %vm2234_vm5 = vmand %vm4298_vm8, %vm4315_vm1  ;;  %v1640_v55 = vcvt.s32.f32 %v4287_v32  ;;  %v4329_v56 = vsub.s32 %v1257_v24, %v3331_v14  ;;  %v828_v43 = vpop.f32.mrf.mxu2 }
 0x179   :  { %2668 = vmatpush.msrb.mxu2 %v2579_v47  ;;  %vm2361_vm9 = vmand %vm2201_vm7, %vm2281_vm6  ;;  %v2074_v33 = vsub.f32 %v1674_v10, %v1994_v48  ;;  %v1778_v23 = vmul.f32 0.055555556, %v1698_v50  ;;  %vm1480_vm3 = vcmp.lt.s32.totalorder %v4287_v32, 324  ;;  %v1270_v52 = vadd.s32 600, %v3328_v11 }
 0x17a   :  { %v2907_v58 = vsel %vm2361_vm9, 1.0, %v3126_v53  ;;  %vm2301_vm14 = vcmp.lt.f32.partialorder %v2061_v51, 16.0  ;;  %vm4334_vm12 = vmand %vm1378_vm11, %vm1458_vm4  ;;  %v1720_v62 = vadd.f32 0.5, %v1640_v55  ;;  %vm1420_vm4 = vcmp.ge.s32.totalorder %v4329_v56, 0 }
 0x17b   :  { %v2601_v38 = vmul.f32 0.00390625, %v2907_v58  ;;  %vm2381_vm13 = vmand %vm2221_vm15, %vm2301_vm14  ;;  %vm2314_vm7 = vcmp.lt.f32.partialorder %v2074_v33, 16.0  ;;  %v1858_v59 = vfloor.f32 %v1778_v23  ;;  %vm1500_vm6 = vcmp.lt.s32.totalorder %v4329_v56, 324  ;;  %v1112_v33 = vpop.f32.mrf.mxu1 }
 0x17c   :  { %v2927_v63 = vsel %vm2381_vm13, 1.0, %v3126_v53  ;;  %vm2394_vm11 = vmand %vm2234_vm5, %vm2314_vm7  ;;  %v1660_v0 = vcvt.s32.f32 %v4329_v56  ;;  %v1800_v20 = vmul.f32 0.055555556, %v1720_v62  ;;  %v4360_v6 = vsub.s32 %v1270_v52, %v3331_v14 }
 0x17d   :  { %2682 = vmatpush.msra.mxu3 %v2601_v38  ;;  %v2621_v1 = vmul.f32 0.00390625, %v2927_v63  ;;  %v2940_v57 = vsel %vm2394_vm11, 1.0, %v3126_v53  ;;  %v1938_v3 = vmul.f32 18.0, %v1858_v59  ;;  %vm4355_vm10 = vcmp.lt.f32.partialorder %v1858_v59, 16.0  ;;  %vm4375_vm5 = vmand %vm1400_vm2, %vm1480_vm3 }
 0x17e   :  { %v2634_v4 = vmul.f32 0.00390625, %v2940_v57  ;;  %v1740_v5 = vadd.f32 0.5, %v1660_v0  ;;  %vm2178_vm8 = vmand %vm4334_vm12, %vm4355_vm10  ;;  %v1214_v10 = vadd.s32 152, %v3328_v11  ;;  %v1236_v8 = vadd.s32 328, %v3328_v11 }
 0x17f   :  { %2698 = vmatpush.msrb.mxu0 %v2621_v1  ;;  %v2018_v7 = vsub.f32 %v1618_v41, %v1938_v3  ;;  %v1256_v13 = vadd.s32 488, %v3328_v11  ;;  %v1880_v15 = vfloor.f32 %v1800_v20  ;;  %vm1433_vm0 = vcmp.ge.s32.totalorder %v4360_v6, 0  ;;  %vm4398_vm2 = vmand %vm1420_vm4, %vm1500_vm6 }
 0x180   :  { %2721 = vmatpush.msra.mxu1 %v2634_v4  ;;  %v1820_v16 = vmul.f32 0.055555556, %v1740_v5  ;;  %vm1513_vm15 = vcmp.lt.s32.totalorder %v4360_v6, 324  ;;  %v1673_v19 = vcvt.s32.f32 %v4360_v6  ;;  %v4381_v18 = vsub.s32 %v1214_v10, %v3331_v14 }
 0x181   :  { %vm2258_vm1 = vcmp.lt.f32.partialorder %v2018_v7, 16.0  ;;  %v4384_v21 = vsub.s32 %v1236_v8, %v3331_v14  ;;  %v1960_v22 = vmul.f32 18.0, %v1880_v15  ;;  %vm4386_vm14 = vcmp.lt.f32.partialorder %v1880_v15, 16.0 }
 0x182   :  { %vm2338_vm9 = vmand %vm2178_vm8, %vm2258_vm1  ;;  %v1900_v9 = vfloor.f32 %v1820_v16  ;;  %v4391_v26 = vsub.s32 %v1256_v13, %v3331_v14  ;;  %v1753_v30 = vadd.f32 0.5, %v1673_v19  ;;  %vm1377_vm12 = vcmp.ge.s32.totalorder %v4381_v18, 0 }
 0x183   :  { %v2884_v27 = vsel %vm2338_vm9, 1.0, %v3126_v53  ;;  %vm1457_vm3 = vcmp.lt.s32.totalorder %v4381_v18, 324  ;;  %v2040_v32 = vsub.f32 %v1640_v55, %v1960_v22  ;;  %vm2200_vm13 = vmand %vm4375_vm5, %vm4386_vm14  ;;  %v1617_v36 = vcvt.s32.f32 %v4381_v18  ;;  %v4503_v18 = vpop.permute.xlu0 %1181 }
 0x184   :  { %v2578_v31 = vmul.f32 0.00390625, %v2884_v27  ;;  %v1980_v24 = vmul.f32 18.0, %v1900_v9  ;;  %vm4408_vm7 = vcmp.lt.f32.partialorder %v1900_v9, 16.0  ;;  %v1833_v35 = vmul.f32 0.055555556, %v1753_v30  ;;  %vm4428_vm14 = vmand %vm1433_vm0, %vm1513_vm15 }
 0x185   :  { %vm1399_vm11 = vcmp.ge.s32.totalorder %v4384_v21, 0  ;;  %vm1479_vm4 = vcmp.lt.s32.totalorder %v4384_v21, 324  ;;  %vm2280_vm6 = vcmp.lt.f32.partialorder %v2040_v32, 16.0  ;;  %vm2220_vm10 = vmand %vm4398_vm2, %vm4408_vm7  ;;  %v1639_v39 = vcvt.s32.f32 %v4384_v21 }
 0x186   :  { %2669 = vmatpush.msrb.mxu2 %v2578_v31  ;;  %v2060_v37 = vsub.f32 %v1660_v0, %v1980_v24  ;;  %vm1419_vm8 = vcmp.ge.s32.totalorder %v4391_v26, 0  ;;  %vm2360_vm1 = vmand %vm2200_vm13, %vm2280_vm6  ;;  %v1913_v40 = vfloor.f32 %v1833_v35  ;;  %v1697_v41 = vadd.f32 0.5, %v1617_v36 }
 0x187   :  { %vm1499_vm5 = vcmp.lt.s32.totalorder %v4391_v26, 324  ;;  %v1659_v42 = vcvt.s32.f32 %v4391_v26  ;;  %v2906_v44 = vsel %vm2360_vm1, 1.0, %v3126_v53  ;;  %v1719_v47 = vadd.f32 0.5, %v1639_v39  ;;  %vm4447_vm0 = vmand %vm1377_vm12, %vm1457_vm3 }
 0x188   :  { %vm2300_vm9 = vcmp.lt.f32.partialorder %v2060_v37, 16.0  ;;  %v1269_v48 = vadd.s32 592, %v3328_v11  ;;  %v2600_v49 = vmul.f32 0.00390625, %v2906_v44  ;;  %v1993_v50 = vmul.f32 18.0, %v1913_v40  ;;  %vm4466_vm2 = vmand %vm1399_vm11, %vm1479_vm4 }
 0x189   :  { %vm2380_vm13 = vmand %vm2220_vm10, %vm2300_vm9  ;;  %vm4438_vm6 = vcmp.lt.f32.partialorder %v1913_v40, 16.0  ;;  %v1777_v23 = vmul.f32 0.055555556, %v1697_v41  ;;  %v1799_v58 = vmul.f32 0.055555556, %v1719_v47  ;;  %v1739_v2 = vadd.f32 0.5, %v1659_v42 }
 0x18a   :  { %v2926_v55 = vsel %vm2380_vm13, 1.0, %v3126_v53  ;;  %v4452_v52 = vsub.s32 %v1269_v48, %v3331_v14  ;;  %v4455_v38 = vadd.f32 %v828_v43, %v4101_v60  ;;  %2683 = vmatpush.msra.mxu3 %v2600_v49  ;;  %v2073_v62 = vsub.f32 %v1673_v19, %v1993_v50  ;;  %vm2233_vm15 = vmand %vm4428_vm14, %vm4438_vm6  ;;  %v960_v50 = vpop.f32.mrf.mxu3 }
 0x18b   :  { %v2620_v59 = vmul.f32 0.00390625, %v2926_v55  ;;  %v1857_v63 = vfloor.f32 %v1777_v23  ;;  %v1176_v0 = vadd.f32 %v1112_v33, %v4324_v54  ;;  %v1879_v60 = vfloor.f32 %v1799_v58  ;;  %vm4479_vm10 = vmand %vm1419_vm8, %vm1499_vm5 }
 0x18c   :  { %v1819_v57 = vmul.f32 0.055555556, %v1739_v2  ;;  %vm1432_vm12 = vcmp.ge.s32.totalorder %v4452_v52, 0  ;;  %vm2313_vm3 = vcmp.lt.f32.partialorder %v2073_v62, 16.0  ;;  %v1672_v4 = vcvt.s32.f32 %v4452_v52 }
 0x18d   :  { %2699 = vmatpush.msrb.mxu0 %v2620_v59  ;;  %v1937_v3 = vmul.f32 18.0, %v1857_v63  ;;  %vm4471_vm7 = vcmp.lt.f32.partialorder %v1857_v63, 16.0  ;;  %vm2393_vm11 = vmand %vm2233_vm15, %vm2313_vm3  ;;  %v1959_v20 = vmul.f32 18.0, %v1879_v60  ;;  %vm4484_vm4 = vcmp.lt.f32.partialorder %v1879_v60, 16.0 }
 0x18e   :  { %v1899_v6 = vfloor.f32 %v1819_v57  ;;  %vm1512_vm1 = vcmp.lt.s32.totalorder %v4452_v52, 324  ;;  %v2939_v7 = vsel %vm2393_vm11, 1.0, %v3126_v53  ;;  %vm2177_vm8 = vmand %vm4447_vm0, %vm4471_vm7  ;;  %v1752_v8 = vadd.f32 0.5, %v1672_v4 }
 0x18f   :  { %v2017_v10 = vsub.f32 %v1617_v36, %v1937_v3  ;;  %v1213_v13 = vadd.s32 144, %v3328_v11  ;;  %v2633_v15 = vmul.f32 0.00390625, %v2939_v7  ;;  %v2039_v16 = vsub.f32 %v1639_v39, %v1959_v20  ;;  %vm2199_vm5 = vmand %vm4466_vm2, %vm4484_vm4 }
 0x190   :  { %v1979_v17 = vmul.f32 18.0, %v1899_v6  ;;  %vm4499_vm9 = vcmp.lt.f32.partialorder %v1899_v6, 16.0  ;;  %v1832_v21 = vmul.f32 0.055555556, %v1752_v8  ;;  %v1235_v25 = vadd.s32 320, %v3328_v11  ;;  %vm4535_vm11 = vmand %vm1432_vm12, %vm1512_vm1 }
 0x191   :  { %vm2257_vm14 = vcmp.lt.f32.partialorder %v2017_v10, 16.0  ;;  %vm2219_vm13 = vmand %vm4479_vm10, %vm4499_vm9  ;;  %v4510_v22 = vsub.s32 %v1213_v13, %v3331_v14  ;;  %2722 = vmatpush.msra.mxu1 %v2633_v15  ;;  %vm2279_vm15 = vcmp.lt.f32.partialorder %v2039_v16, 16.0  ;;  %v1255_v26 = vadd.s32 480, %v3328_v11 }
 0x192   :  { %vm2337_vm6 = vmand %vm2177_vm8, %vm2257_vm14  ;;  %v2059_v9 = vsub.f32 %v1659_v42, %v1979_v17  ;;  %v1268_v27 = vadd.s32 584, %v3328_v11  ;;  %v1912_v30 = vfloor.f32 %v1832_v21  ;;  %v4527_v31 = vadd.f32 %v4503_v18, %v1176_v0 }
 0x193   :  { %v2883_v29 = vsel %vm2337_vm6, 1.0, %v3126_v53  ;;  %vm2359_vm3 = vmand %vm2199_vm5, %vm2279_vm15  ;;  %vm1376_vm0 = vcmp.ge.s32.totalorder %v4510_v22, 0  ;;  %v1616_v35 = vcvt.s32.f32 %v4510_v22  ;;  %v4550_v40 = vsub.s32 %v1235_v25, %v3331_v14 }
 0x194   :  { %v2577_v32 = vmul.f32 0.00390625, %v2883_v29  ;;  %v2905_v24 = vsel %vm2359_vm3, 1.0, %v3126_v53  ;;  %vm2299_vm7 = vcmp.lt.f32.partialorder %v2059_v9, 16.0  ;;  %v1992_v37 = vmul.f32 18.0, %v1912_v30 }
 0x195   :  { %v2599_v36 = vmul.f32 0.00390625, %v2905_v24  ;;  %vm2379_vm2 = vmand %vm2219_vm13, %vm2299_vm7  ;;  %vm4545_vm4 = vcmp.lt.f32.partialorder %v1912_v30, 16.0  ;;  %v1696_v42 = vadd.f32 0.5, %v1616_v35  ;;  %v4554_v43 = vsub.s32 %v1255_v26, %v3331_v14 }
 0x196   :  { %2670 = vmatpush.msrb.mxu2 %v2577_v32  ;;  %v2925_v41 = vsel %vm2379_vm2, 1.0, %v3126_v53  ;;  %v4557_v44 = vsub.s32 %v1268_v27, %v3331_v14  ;;  %v2072_v47 = vsub.f32 %v1672_v4, %v1992_v37  ;;  %vm2232_vm12 = vmand %vm4535_vm11, %vm4545_vm4  ;;  %vm1456_vm10 = vcmp.lt.s32.totalorder %v4510_v22, 324 }
 0x197   :  { %2684 = vmatpush.msra.mxu3 %v2599_v36  ;;  %v2619_v45 = vmul.f32 0.00390625, %v2925_v41  ;;  %vm1398_vm1 = vcmp.ge.s32.totalorder %v4550_v40, 0  ;;  %v1776_v48 = vmul.f32 0.055555556, %v1696_v42  ;;  %vm1478_vm8 = vcmp.lt.s32.totalorder %v4550_v40, 324  ;;  %vm4578_vm3 = vmand %vm1376_vm0, %vm1456_vm10  ;;  %v1092_v41 = vpop.f32.mrf.mxu0 }
 0x198   :  { %v1638_v49 = vcvt.s32.f32 %v4550_v40  ;;  %vm1418_vm5 = vcmp.ge.s32.totalorder %v4554_v43, 0  ;;  %vm2312_vm9 = vcmp.lt.f32.partialorder %v2072_v47, 16.0  ;;  %vm1498_vm14 = vcmp.lt.s32.totalorder %v4554_v43, 324  ;;  %vm4594_vm0 = vmand %vm1398_vm1, %vm1478_vm8 }
 0x199   :  { %2700 = vmatpush.msrb.mxu0 %v2619_v45  ;;  %v1658_v51 = vcvt.s32.f32 %v4554_v43  ;;  %vm1431_vm13 = vcmp.ge.s32.totalorder %v4557_v44, 0  ;;  %vm2392_vm6 = vmand %vm2232_vm12, %vm2312_vm9  ;;  %v1856_v33 = vfloor.f32 %v1776_v48  ;;  %vm1511_vm15 = vcmp.lt.s32.totalorder %v4557_v44, 324 }
 0x19a   :  { %v1718_v23 = vadd.f32 0.5, %v1638_v49  ;;  %v1671_v55 = vcvt.s32.f32 %v4557_v44  ;;  %v2938_v56 = vsel %vm2392_vm6, 1.0, %v3126_v53  ;;  %v4583_v52 = vadd.f32 %v960_v50, %v4455_v38  ;;  %vm4612_vm2 = vmand %vm1418_vm5, %vm1498_vm14 }
 0x19b   :  { %v1738_v2 = vadd.f32 0.5, %v1658_v51  ;;  %v1212_v59 = vadd.s32 136, %v3328_v11  ;;  %v2632_v62 = vmul.f32 0.00390625, %v2938_v56  ;;  %v1936_v63 = vmul.f32 18.0, %v1856_v33  ;;  %vm4626_vm8 = vmand %vm1431_vm13, %vm1511_vm15 }
 0x19c   :  { %vm4586_vm7 = vcmp.lt.f32.partialorder %v1856_v33, 16.0  ;;  %v1798_v1 = vmul.f32 0.055555556, %v1718_v23  ;;  %v1751_v38 = vadd.f32 0.5, %v1671_v55  ;;  %v1234_v28 = vadd.s32 312, %v3328_v11 }
 0x19d   :  { %v1818_v57 = vmul.f32 0.055555556, %v1738_v2  ;;  %v4599_v3 = vsub.s32 %v1212_v59, %v3331_v14  ;;  %2723 = vmatpush.msra.mxu1 %v2632_v62  ;;  %v2016_v54 = vsub.f32 %v1616_v35, %v1936_v63  ;;  %vm2176_vm11 = vmand %vm4578_vm3, %vm4586_vm7  ;;  %v1254_v20 = vadd.s32 472, %v3328_v11 }
 0x19e   :  { %v1878_v4 = vfloor.f32 %v1798_v1  ;;  %v1267_v5 = vadd.s32 576, %v3328_v11  ;;  %v1831_v10 = vmul.f32 0.055555556, %v1751_v38  ;;  %v4636_v22 = vsub.s32 %v1234_v28, %v3331_v14 }
 0x19f   :  { %v1898_v7 = vfloor.f32 %v1818_v57  ;;  %vm1375_vm4 = vcmp.ge.s32.totalorder %v4599_v3, 0  ;;  %vm1455_vm12 = vcmp.lt.s32.totalorder %v4599_v3, 324  ;;  %vm2256_vm10 = vcmp.lt.f32.partialorder %v2016_v54, 16.0 }
 0x1a0   :  { %v1958_v8 = vmul.f32 18.0, %v1878_v4  ;;  %vm4618_vm1 = vcmp.lt.f32.partialorder %v1878_v4, 16.0  ;;  %v1615_v16 = vcvt.s32.f32 %v4599_v3  ;;  %vm2336_vm5 = vmand %vm2176_vm11, %vm2256_vm10  ;;  %v1911_v21 = vfloor.f32 %v1831_v10 }
 0x1a1   :  { %v1978_v17 = vmul.f32 18.0, %v1898_v7  ;;  %vm4631_vm9 = vcmp.lt.f32.partialorder %v1898_v7, 16.0  ;;  %v2882_v25 = vsel %vm2336_vm5, 1.0, %v3126_v53  ;;  %vm2198_vm14 = vmand %vm4594_vm0, %vm4618_vm1  ;;  %v4644_v27 = vsub.s32 %v1254_v20, %v3331_v14 }
 0x1a2   :  { %v2038_v9 = vsub.f32 %v1638_v49, %v1958_v8  ;;  %v1695_v26 = vadd.f32 0.5, %v1615_v16  ;;  %v2576_v29 = vmul.f32 0.00390625, %v2882_v25  ;;  %vm2218_vm13 = vmand %vm4612_vm2, %vm4631_vm9  ;;  %v1991_v32 = vmul.f32 18.0, %v1911_v21 }
 0x1a3   :  { %v2058_v30 = vsub.f32 %v1658_v51, %v1978_v17  ;;  %vm4650_vm6 = vcmp.lt.f32.partialorder %v1911_v21, 16.0  ;;  %vm1477_vm0 = vcmp.lt.s32.totalorder %v4636_v22, 324  ;;  %v1637_v36 = vcvt.s32.f32 %v4636_v22 }
 0x1a4   :  { %vm2278_vm15 = vcmp.lt.f32.partialorder %v2038_v9, 16.0  ;;  %vm2231_vm3 = vmand %vm4626_vm8, %vm4650_vm6  ;;  %v1775_v34 = vmul.f32 0.055555556, %v1695_v26  ;;  %2671 = vmatpush.msrb.mxu2 %v2576_v29  ;;  %v2071_v35 = vsub.f32 %v1671_v55, %v1991_v32  ;;  %vm1417_vm1 = vcmp.ge.s32.totalorder %v4644_v27, 0 }
 0x1a5   :  { %vm2358_vm11 = vmand %vm2198_vm14, %vm2278_vm15  ;;  %vm2298_vm10 = vcmp.lt.f32.partialorder %v2058_v30, 16.0  ;;  %vm1497_vm7 = vcmp.lt.s32.totalorder %v4644_v27, 324  ;;  %v1657_v40 = vcvt.s32.f32 %v4644_v27  ;;  %v1717_v45 = vadd.f32 0.5, %v1637_v36 }
 0x1a6   :  { %v2904_v37 = vsel %vm2358_vm11, 1.0, %v3126_v53  ;;  %vm2378_vm5 = vmand %vm2218_vm13, %vm2298_vm10  ;;  %v1855_v39 = vfloor.f32 %v1775_v34  ;;  %vm2311_vm14 = vcmp.lt.f32.partialorder %v2071_v35, 16.0  ;;  %v1350_v23 = vsub.s32 %v1267_v5, %v3331_v14 }
 0x1a7   :  { %v2598_v42 = vmul.f32 0.00390625, %v2904_v37  ;;  %v2924_v43 = vsel %vm2378_vm5, 1.0, %v3126_v53  ;;  %vm4675_vm15 = vmand %vm1375_vm4, %vm1455_vm12  ;;  %v1737_v50 = vadd.f32 0.5, %v1657_v40  ;;  %v1797_v33 = vmul.f32 0.055555556, %v1717_v45 }
 0x1a8   :  { %v2618_v47 = vmul.f32 0.00390625, %v2924_v43  ;;  %vm2391_vm2 = vmand %vm2231_vm3, %vm2311_vm14  ;;  %v1935_v48 = vmul.f32 18.0, %v1855_v39  ;;  %vm4684_vm9 = vcmp.lt.f32.partialorder %v1855_v39, 16.0  ;;  %v1175_v55 = vadd.f32 %v1092_v41, %v4583_v52 }
 0x1a9   :  { %2685 = vmatpush.msra.mxu3 %v2598_v42  ;;  %v2937_v51 = vsel %vm2391_vm2, 1.0, %v3126_v53  ;;  %vm2175_vm4 = vmand %vm4675_vm15, %vm4684_vm9  ;;  %v1817_v2 = vmul.f32 0.055555556, %v1737_v50  ;;  %v1211_v59 = vadd.s32 128, %v3328_v11  ;;  %vm5638_vm12 = vcmp.ge.s32.totalorder %v4636_v22, 0 }
 0x1aa   :  { %2701 = vmatpush.msrb.mxu0 %v2618_v47  ;;  %v2631_v56 = vmul.f32 0.00390625, %v2937_v51  ;;  %v2015_v58 = vsub.f32 %v1615_v16, %v1935_v48  ;;  %vm4700_vm8 = vmand %vm5638_vm12, %vm1477_vm0  ;;  %v1877_v52 = vfloor.f32 %v1797_v33  ;;  %vm1430_vm13 = vcmp.ge.s32.totalorder %v1350_v23, 0 }
 0x1ab   :  { %vm1510_vm6 = vcmp.lt.s32.totalorder %v1350_v23, 324  ;;  %v1670_v63 = vcvt.s32.f32 %v1350_v23  ;;  %vm4708_vm11 = vmand %vm1417_vm1, %vm1497_vm7  ;;  %v1897_v1 = vfloor.f32 %v1817_v2  ;;  %v1184_v60 = vadd.f32 %v4503_v18, %v1175_v55 }
 0x1ac   :  { %2724 = vmatpush.msra.mxu1 %v2631_v56  ;;  %vm2255_vm3 = vcmp.lt.f32.partialorder %v2015_v58, 16.0  ;;  %v4714_v57 = vsub.s32 %v1211_v59, %v3331_v14  ;;  %v1957_v38 = vmul.f32 18.0, %v1877_v52  ;;  %vm4716_vm10 = vcmp.lt.f32.partialorder %v1877_v52, 16.0  ;;  %vm4742_vm2 = vmand %vm1430_vm13, %vm1510_vm6 }
 0x1ad   :  { %vm2335_vm0 = vmand %vm2175_vm4, %vm2255_vm3  ;;  %v1750_v28 = vadd.f32 0.5, %v1670_v63  ;;  %v1233_v54 = vadd.s32 304, %v3328_v11  ;;  %v1977_v20 = vmul.f32 18.0, %v1897_v1  ;;  %vm4722_vm7 = vcmp.lt.f32.partialorder %v1897_v1, 16.0 }
 0x1ae   :  { %v2881_v4 = vsel %vm2335_vm0, 1.0, %v3126_v53  ;;  %v1189_v6 = vmax.f32 %v1184_v60, 0.0  ;;  %v1190_v7 = vmax.f32 %v4527_v31, 0.0  ;;  %v2037_v8 = vsub.f32 %v1637_v36, %v1957_v38  ;;  %vm2197_vm1 = vmand %vm4700_vm8, %vm4716_vm10 }
 0x1af   :  { %v2575_v10 = vmul.f32 0.00390625, %v2881_v4  ;;  %v1830_v13 = vmul.f32 0.055555556, %v1750_v28  ;;  %v2057_v15 = vsub.f32 %v1657_v40, %v1977_v20  ;;  %vm2217_vm5 = vmand %vm4708_vm11, %vm4722_vm7  ;;  %vm1374_vm14 = vcmp.ge.s32.totalorder %v4714_v57, 0 }
 0x1b0   :  { %v1614_v16 = vcvt.s32.f32 %v4714_v57  ;;  %v4738_v17 = vsub.s32 %v1233_v54, %v3331_v14  ;;  %2654 = vmatmul.f32.vlgmr.msrb.gmra.mxu1 %v1189_v6  ;;  %vm2277_vm15 = vcmp.lt.f32.partialorder %v2037_v8, 16.0  ;;  %v1253_v22 = vadd.s32 464, %v3328_v11 }
 0x1b1   :  { %2672 = vmatpush.msrb.mxu2 %v2575_v10  ;;  %v1910_v21 = vfloor.f32 %v1830_v13  ;;  %v1266_v25 = vadd.s32 568, %v3328_v11  ;;  %vm2357_vm9 = vmand %vm2197_vm1, %vm2277_vm15  ;;  %vm2297_vm4 = vcmp.lt.f32.partialorder %v2057_v15, 16.0  ;;  %vm1454_vm12 = vcmp.lt.s32.totalorder %v4714_v57, 324  ;;  %v4837_v13 = vpop.f32.mrf.mxu2 }
 0x1b2   :  { %v1694_v9 = vadd.f32 0.5, %v1614_v16  ;;  %vm1396_vm8 = vcmp.ge.s32.totalorder %v4738_v17, 0  ;;  %v2903_v26 = vsel %vm2357_vm9, 1.0, %v3126_v53  ;;  %vm2377_vm13 = vmand %vm2217_vm5, %vm2297_vm4  ;;  %v1636_v30 = vcvt.s32.f32 %v4738_v17 }
 0x1b3   :  { %v1990_v27 = vmul.f32 18.0, %v1910_v21  ;;  %vm4756_vm6 = vcmp.lt.f32.partialorder %v1910_v21, 16.0  ;;  %v2597_v32 = vmul.f32 0.00390625, %v2903_v26  ;;  %v2923_v24 = vsel %vm2377_vm13, 1.0, %v3126_v53  ;;  %vm4775_vm7 = vmand %vm1374_vm14, %vm1454_vm12 }
 0x1b4   :  { %v1774_v34 = vmul.f32 0.055555556, %v1694_v9  ;;  %v1336_v35 = vsub.s32 %v1253_v22, %v3331_v14  ;;  %v2617_v36 = vmul.f32 0.00390625, %v2923_v24  ;;  %vm2230_vm3 = vmand %vm4742_vm2, %vm4756_vm6  ;;  %v1716_v39 = vadd.f32 0.5, %v1636_v30 }
 0x1b5   :  { %v2070_v37 = vsub.f32 %v1670_v63, %v1990_v27  ;;  %v4768_v40 = vsub.s32 %v1266_v25, %v3331_v14  ;;  %2686 = vmatpush.msra.mxu3 %v2597_v32  ;;  %vm1476_vm11 = vcmp.lt.s32.totalorder %v4738_v17, 324  ;;  %v1232_v23 = vadd.s32 296, %v3328_v11 }
 0x1b6   :  { %v1854_v41 = vfloor.f32 %v1774_v34  ;;  %vm1416_vm0 = vcmp.ge.s32.totalorder %v1336_v35, 0  ;;  %v1656_v42 = vcvt.s32.f32 %v1336_v35  ;;  %2702 = vmatpush.msrb.mxu0 %v2617_v36  ;;  %v1796_v44 = vmul.f32 0.055555556, %v1716_v39  ;;  %vm4790_vm14 = vmand %vm1396_vm8, %vm1476_vm11 }
 0x1b7   :  { %vm2310_vm10 = vcmp.lt.f32.partialorder %v2070_v37, 16.0  ;;  %vm1496_vm1 = vcmp.lt.s32.totalorder %v1336_v35, 324  ;;  %vm1429_vm5 = vcmp.ge.s32.totalorder %v4768_v40, 0  ;;  %v1669_v49 = vcvt.s32.f32 %v4768_v40 }
 0x1b8   :  { %vm2390_vm15 = vmand %vm2230_vm3, %vm2310_vm10  ;;  %v1934_v45 = vmul.f32 18.0, %v1854_v41  ;;  %vm4780_vm2 = vcmp.lt.f32.partialorder %v1854_v41, 16.0  ;;  %v1736_v48 = vadd.f32 0.5, %v1656_v42  ;;  %v1876_v33 = vfloor.f32 %v1796_v44 }
 0x1b9   :  { %v2936_v50 = vsel %vm2390_vm15, 1.0, %v3126_v53  ;;  %v1252_v55 = vadd.s32 456, %v3328_v11  ;;  %vm2174_vm9 = vmand %vm4775_vm7, %vm4780_vm2  ;;  %v1749_v59 = vadd.f32 0.5, %v1669_v49  ;;  %vm1509_vm8 = vcmp.lt.s32.totalorder %v4768_v40, 324 }
 0x1ba   :  { %v2630_v56 = vmul.f32 0.00390625, %v2936_v50  ;;  %v2014_v58 = vsub.f32 %v1614_v16, %v1934_v45  ;;  %v1816_v2 = vmul.f32 0.055555556, %v1736_v48  ;;  %v1956_v62 = vmul.f32 18.0, %v1876_v33  ;;  %vm4806_vm12 = vmand %vm1416_vm0, %vm1496_vm1 }
 0x1bb   :  { %vm4800_vm4 = vcmp.lt.f32.partialorder %v1876_v33, 16.0  ;;  %v1315_v0 = vsub.s32 %v1232_v23, %v3331_v14  ;;  %v1829_v60 = vmul.f32 0.055555556, %v1749_v59  ;;  %v4817_v57 = vsub.s32 %v1252_v55, %v3331_v14  ;;  %vm4829_vm10 = vmand %vm1429_vm5, %vm1509_vm8  ;;  %v4914_v55 = vpop.f32.mrf.mxu2 }
 0x1bc   :  { %2725 = vmatpush.msra.mxu1 %v2630_v56  ;;  %vm2254_vm13 = vcmp.lt.f32.partialorder %v2014_v58, 16.0  ;;  %vm2196_vm6 = vmand %vm4790_vm14, %vm4800_vm4  ;;  %v1896_v1 = vfloor.f32 %v1816_v2  ;;  %v2036_v38 = vsub.f32 %v1636_v30, %v1956_v62  ;;  %v1265_v28 = vadd.s32 560, %v3328_v11 }
 0x1bd   :  { %vm2334_vm3 = vmand %vm2174_vm9, %vm2254_vm13  ;;  %vm1395_vm11 = vcmp.ge.s32.totalorder %v1315_v0, 0  ;;  %v1635_v3 = vcvt.s32.f32 %v1315_v0  ;;  %v1909_v6 = vfloor.f32 %v1829_v60  ;;  %vm1475_vm15 = vcmp.lt.s32.totalorder %v1315_v0, 324 }
 0x1be   :  { %v2880_v54 = vsel %vm2334_vm3, 1.0, %v3126_v53  ;;  %v1976_v4 = vmul.f32 18.0, %v1896_v1  ;;  %vm4821_vm0 = vcmp.lt.f32.partialorder %v1896_v1, 16.0  ;;  %vm2276_vm7 = vcmp.lt.f32.partialorder %v2036_v38, 16.0 }
 0x1bf   :  { %v2574_v10 = vmul.f32 0.00390625, %v2880_v54  ;;  %vm2216_vm1 = vmand %vm4806_vm12, %vm4821_vm0  ;;  %v1715_v8 = vadd.f32 0.5, %v1635_v3  ;;  %v1989_v16 = vmul.f32 18.0, %v1909_v6  ;;  %vm4844_vm2 = vcmp.lt.f32.partialorder %v1909_v6, 16.0 }
 0x1c0   :  { %vm2356_vm5 = vmand %vm2196_vm6, %vm2276_vm7  ;;  %v2056_v15 = vsub.f32 %v1656_v42, %v1976_v4  ;;  %vm1415_vm9 = vcmp.ge.s32.totalorder %v4817_v57, 0  ;;  %v1655_v22 = vcvt.s32.f32 %v4817_v57  ;;  %v4852_v25 = vsub.s32 %v1265_v28, %v3331_v14 }
 0x1c1   :  { %2673 = vmatpush.msrb.mxu2 %v2574_v10  ;;  %v2902_v19 = vsel %vm2356_vm5, 1.0, %v3126_v53  ;;  %v1795_v21 = vmul.f32 0.055555556, %v1715_v8  ;;  %v2069_v26 = vsub.f32 %v1669_v49, %v1989_v16  ;;  %vm2229_vm4 = vmand %vm4829_vm10, %vm4844_vm2  ;;  %v1231_v27 = vadd.s32 288, %v3328_v11 }
 0x1c2   :  { %v2596_v9 = vmul.f32 0.00390625, %v2902_v19  ;;  %vm2296_vm14 = vcmp.lt.f32.partialorder %v2056_v15, 16.0  ;;  %2674 = vmatmul.f32.vlgmr.msrb.gmra.mxu2 %v1190_v7  ;;  %vm1495_vm13 = vcmp.lt.s32.totalorder %v4817_v57, 324  ;;  %v1735_v30 = vadd.f32 0.5, %v1655_v22  ;;  %vm4871_vm7 = vmand %vm1395_vm11, %vm1475_vm15 }
 0x1c3   :  { %vm2376_vm8 = vmand %vm2216_vm1, %vm2296_vm14  ;;  %v1875_v29 = vfloor.f32 %v1795_v21  ;;  %vm1428_vm6 = vcmp.ge.s32.totalorder %v4852_v25, 0  ;;  %vm2309_vm3 = vcmp.lt.f32.partialorder %v2069_v26, 16.0  ;;  %v1668_v7 = vcvt.s32.f32 %v4852_v25 }
 0x1c4   :  { %2687 = vmatpush.msra.mxu3 %v2596_v9  ;;  %v2922_v32 = vsel %vm2376_vm8, 1.0, %v3126_v53  ;;  %v1314_v24 = vsub.s32 %v1231_v27, %v3331_v14  ;;  %vm2389_vm12 = vmand %vm2229_vm4, %vm2309_vm3  ;;  %v1815_v37 = vmul.f32 0.055555556, %v1735_v30  ;;  %vm1508_vm11 = vcmp.lt.s32.totalorder %v4852_v25, 324  ;;  %v1132_v30 = vpop.f32.mrf.mxu2 }
 0x1c5   :  { %v2616_v34 = vmul.f32 0.00390625, %v2922_v32  ;;  %v1955_v35 = vmul.f32 18.0, %v1875_v29  ;;  %vm4882_vm0 = vcmp.lt.f32.partialorder %v1875_v29, 16.0  ;;  %v2935_v39 = vsel %vm2389_vm12, 1.0, %v3126_v53  ;;  %vm4896_vm15 = vmand %vm1415_vm9, %vm1495_vm13 }
 0x1c6   :  { %v1748_v40 = vadd.f32 0.5, %v1668_v7  ;;  %vm1394_vm1 = vcmp.ge.s32.totalorder %v1314_v24, 0  ;;  %v2629_v41 = vmul.f32 0.00390625, %v2935_v39  ;;  %vm2195_vm10 = vmand %vm4871_vm7, %vm4882_vm0  ;;  %v1895_v43 = vfloor.f32 %v1815_v37 }
 0x1c7   :  { %2703 = vmatpush.msrb.mxu0 %v2616_v34  ;;  %v2035_v42 = vsub.f32 %v1635_v3, %v1955_v35  ;;  %v1634_v44 = vcvt.s32.f32 %v1314_v24  ;;  %vm1474_vm5 = vcmp.lt.s32.totalorder %v1314_v24, 324  ;;  %v1251_v48 = vadd.s32 448, %v3328_v11  ;;  %vm4910_vm9 = vmand %vm1428_vm6, %vm1508_vm11 }
 0x1c8   :  { %v1828_v47 = vmul.f32 0.055555556, %v1748_v40  ;;  %v1264_v49 = vadd.s32 552, %v3328_v11  ;;  %2726 = vmatpush.msra.mxu1 %v2629_v41  ;;  %v1975_v50 = vmul.f32 18.0, %v1895_v43  ;;  %vm4902_vm14 = vcmp.lt.f32.partialorder %v1895_v43, 16.0  ;;  %vm4938_vm6 = vmand %vm1394_vm1, %vm1474_vm5 }
 0x1c9   :  { %vm2275_vm2 = vcmp.lt.f32.partialorder %v2035_v42, 16.0  ;;  %v1714_v23 = vadd.f32 0.5, %v1634_v44  ;;  %v4922_v58 = vsub.s32 %v1251_v48, %v3331_v14  ;;  %vm2215_vm8 = vmand %vm4896_vm15, %vm4902_vm14  ;;  %v1230_v3 = vadd.s32 280, %v3328_v11 }
 0x1ca   :  { %vm2355_vm4 = vmand %vm2195_vm10, %vm2275_vm2  ;;  %v1908_v56 = vfloor.f32 %v1828_v47  ;;  %v4925_v2 = vsub.s32 %v1264_v49, %v3331_v14  ;;  %v2055_v62 = vsub.f32 %v1655_v22, %v1975_v50  ;;  %v1250_v19 = vadd.s32 440, %v3328_v11 }
 0x1cb   :  { %v2901_v59 = vsel %vm2355_vm4, 1.0, %v3126_v53  ;;  %v1794_v52 = vmul.f32 0.055555556, %v1714_v23  ;;  %v1654_v38 = vcvt.s32.f32 %v4922_v58  ;;  %vm1414_vm0 = vcmp.ge.s32.totalorder %v4922_v58, 0  ;;  %v1040_v23 = vpop.f32.mrf.mxu3 }
 0x1cc   :  { %v2595_v63 = vmul.f32 0.00390625, %v2901_v59  ;;  %v1988_v0 = vmul.f32 18.0, %v1908_v56  ;;  %vm4932_vm13 = vcmp.lt.f32.partialorder %v1908_v56, 16.0  ;;  %vm2295_vm3 = vcmp.lt.f32.partialorder %v2055_v62, 16.0 }
 0x1cd   :  { %vm2228_vm7 = vmand %vm4910_vm9, %vm4932_vm13  ;;  %v1874_v57 = vfloor.f32 %v1794_v52  ;;  %vm1494_vm11 = vcmp.lt.s32.totalorder %v4922_v58, 324  ;;  %v1667_v54 = vcvt.s32.f32 %v4925_v2  ;;  %v1734_v6 = vadd.f32 0.5, %v1654_v38 }
 0x1ce   :  { %2688 = vmatpush.msra.mxu3 %v2595_v63  ;;  %vm2375_vm12 = vmand %vm2215_vm8, %vm2295_vm3  ;;  %v2068_v28 = vsub.f32 %v1668_v7, %v1988_v0  ;;  %vm1427_vm5 = vcmp.ge.s32.totalorder %v4925_v2, 0  ;;  %v4967_v17 = vsub.s32 %v1230_v3, %v3331_v14  ;;  %vm1507_vm14 = vcmp.lt.s32.totalorder %v4925_v2, 324 }
 0x1cf   :  { %v2921_v4 = vsel %vm2375_vm12, 1.0, %v3126_v53  ;;  %v1954_v20 = vmul.f32 18.0, %v1874_v57  ;;  %vm4952_vm1 = vcmp.lt.f32.partialorder %v1874_v57, 16.0  ;;  %v1747_v8 = vadd.f32 0.5, %v1667_v54  ;;  %vm4977_vm9 = vmand %vm1414_vm0, %vm1494_vm11 }
 0x1d0   :  { %v2615_v10 = vmul.f32 0.00390625, %v2921_v4  ;;  %vm2308_vm10 = vcmp.lt.f32.partialorder %v2068_v28, 16.0  ;;  %vm2194_vm15 = vmand %vm4938_vm6, %vm4952_vm1  ;;  %v1814_v16 = vmul.f32 0.055555556, %v1734_v6  ;;  %v1263_v25 = vadd.s32 544, %v3328_v11 }
 0x1d1   :  { %vm2388_vm2 = vmand %vm2228_vm7, %vm2308_vm10  ;;  %v2034_v15 = vsub.f32 %v1634_v44, %v1954_v20  ;;  %v1827_v22 = vmul.f32 0.055555556, %v1747_v8  ;;  %vm1393_vm8 = vcmp.ge.s32.totalorder %v4967_v17, 0  ;;  %vm1473_vm3 = vcmp.lt.s32.totalorder %v4967_v17, 324 }
 0x1d2   :  { %2704 = vmatpush.msrb.mxu0 %v2615_v10  ;;  %v2934_v21 = vsel %vm2388_vm2, 1.0, %v3126_v53  ;;  %v1894_v27 = vfloor.f32 %v1814_v16  ;;  %v1633_v32 = vcvt.s32.f32 %v4967_v17  ;;  %v4990_v31 = vsub.s32 %v1250_v19, %v3331_v14  ;;  %vm5001_vm6 = vmand %vm1427_vm5, %vm1507_vm14 }
 0x1d3   :  { %v2628_v9 = vmul.f32 0.00390625, %v2934_v21  ;;  %vm2274_vm4 = vcmp.lt.f32.partialorder %v2034_v15, 16.0  ;;  %v1907_v29 = vfloor.f32 %v1827_v22  ;;  %v5006_v36 = vsub.s32 %v1263_v25, %v3331_v14  ;;  %vm5030_vm5 = vmand %vm1393_vm8, %vm1473_vm3 }
 0x1d4   :  { %vm2354_vm13 = vmand %vm2194_vm15, %vm2274_vm4  ;;  %v1974_v24 = vmul.f32 18.0, %v1894_v27  ;;  %vm4993_vm7 = vcmp.lt.f32.partialorder %v1894_v27, 16.0  ;;  %v1713_v41 = vadd.f32 0.5, %v1633_v32  ;;  %v915_v42 = vadd.f32 %v4837_v13, %v3767_v12 }
 0x1d5   :  { %2727 = vmatpush.msra.mxu1 %v2628_v9  ;;  %v2900_v7 = vsel %vm2354_vm13, 1.0, %v3126_v53  ;;  %v1987_v39 = vmul.f32 18.0, %v1907_v29  ;;  %vm5008_vm12 = vcmp.lt.f32.partialorder %v1907_v29, 16.0  ;;  %vm2214_vm0 = vmand %vm4977_vm9, %vm4993_vm7  ;;  %v1177_v44 = vadd.f32 %v1132_v30, %v3971_v61 }
 0x1d6   :  { %v2594_v37 = vmul.f32 0.00390625, %v2900_v7  ;;  %v2054_v43 = vsub.f32 %v1654_v38, %v1974_v24  ;;  %v1653_v45 = vcvt.s32.f32 %v4990_v31  ;;  %vm2227_vm11 = vmand %vm5001_vm6, %vm5008_vm12  ;;  %v1793_v48 = vmul.f32 0.055555556, %v1713_v41 }
 0x1d7   :  { %v2067_v47 = vsub.f32 %v1667_v54, %v1987_v39  ;;  %vm1413_vm1 = vcmp.ge.s32.totalorder %v4990_v31, 0  ;;  %vm1493_vm10 = vcmp.lt.s32.totalorder %v4990_v31, 324  ;;  %vm1426_vm2 = vcmp.ge.s32.totalorder %v5006_v36, 0 }
 0x1d8   :  { %2689 = vmatpush.msra.mxu3 %v2594_v37  ;;  %vm2294_vm15 = vcmp.lt.f32.partialorder %v2054_v43, 16.0  ;;  %v1733_v61 = vadd.f32 0.5, %v1653_v45  ;;  %v1666_v13 = vcvt.s32.f32 %v5006_v36  ;;  %v1873_v49 = vfloor.f32 %v1793_v48  ;;  %vm5054_vm3 = vmand %vm1413_vm1, %vm1493_vm10 }
 0x1d9   :  { %vm2374_vm14 = vmand %vm2214_vm0, %vm2294_vm15  ;;  %vm2307_vm4 = vcmp.lt.f32.partialorder %v2067_v47, 16.0  ;;  %v1229_v50 = vadd.s32 272, %v3328_v11  ;;  %v1249_v51 = vadd.s32 432, %v3328_v11  ;;  %vm1506_vm8 = vcmp.lt.s32.totalorder %v5006_v36, 324 }
 0x1da   :  { %v2920_v33 = vsel %vm2374_vm14, 1.0, %v3126_v53  ;;  %vm2387_vm9 = vmand %vm2227_vm11, %vm2307_vm4  ;;  %v1813_v56 = vmul.f32 0.055555556, %v1733_v61  ;;  %v1746_v58 = vadd.f32 0.5, %v1666_v13  ;;  %v1953_v62 = vmul.f32 18.0, %v1873_v49 }
 0x1db   :  { %v2614_v2 = vmul.f32 0.00390625, %v2920_v33  ;;  %v2933_v59 = vsel %vm2387_vm9, 1.0, %v3126_v53  ;;  %vm5046_vm13 = vcmp.lt.f32.partialorder %v1873_v49, 16.0  ;;  %v5058_v57 = vadd.f32 %v1040_v23, %v915_v42  ;;  %vm5076_vm12 = vmand %vm1426_vm2, %vm1506_vm8 }
 0x1dc   :  { %v2627_v63 = vmul.f32 0.00390625, %v2933_v59  ;;  %v1893_v1 = vfloor.f32 %v1813_v56  ;;  %v1826_v60 = vmul.f32 0.055555556, %v1746_v58  ;;  %v2033_v38 = vsub.f32 %v1633_v32, %v1953_v62  ;;  %vm2193_vm7 = vmand %vm5030_vm5, %vm5046_vm13 }
 0x1dd   :  { %2705 = vmatpush.msrb.mxu0 %v2614_v2  ;;  %v1312_v3 = vsub.s32 %v1229_v50, %v3331_v14  ;;  %v5066_v28 = vsub.s32 %v1249_v51, %v3331_v14  ;;  %v1262_v6 = vadd.s32 536, %v3328_v11  ;;  %v5082_v10 = vadd.f32 %v4503_v18, %v1177_v44 }
 0x1de   :  { %2728 = vmatpush.msra.mxu1 %v2627_v63  ;;  %v1973_v54 = vmul.f32 18.0, %v1893_v1  ;;  %vm5068_vm6 = vcmp.lt.f32.partialorder %v1893_v1, 16.0  ;;  %v1906_v5 = vfloor.f32 %v1826_v60  ;;  %vm2273_vm0 = vcmp.lt.f32.partialorder %v2033_v38, 16.0 }
 0x1df   :  { %vm2213_vm11 = vmand %vm5054_vm3, %vm5068_vm6  ;;  %v1632_v8 = vcvt.s32.f32 %v1312_v3  ;;  %v1228_v15 = vadd.s32 264, %v3328_v11  ;;  %vm1392_vm15 = vcmp.ge.s32.totalorder %v1312_v3, 0  ;;  %vm1472_vm5 = vcmp.lt.s32.totalorder %v1312_v3, 324 }
 0x1e0   :  { %vm2353_vm1 = vmand %vm2193_vm7, %vm2273_vm0  ;;  %v2053_v16 = vsub.f32 %v1653_v45, %v1973_v54  ;;  %v1986_v17 = vmul.f32 18.0, %v1906_v5  ;;  %vm5089_vm10 = vcmp.lt.f32.partialorder %v1906_v5, 16.0  ;;  %v1652_v25 = vcvt.s32.f32 %v5066_v28 }
 0x1e1   :  { %v2899_v21 = vsel %vm2353_vm1, 1.0, %v3126_v53  ;;  %v1712_v22 = vadd.f32 0.5, %v1632_v8  ;;  %vm2226_vm14 = vmand %vm5076_vm12, %vm5089_vm10  ;;  %v5100_v27 = vsub.s32 %v1262_v6, %v3331_v14  ;;  %vm1412_vm9 = vcmp.ge.s32.totalorder %v5066_v28, 0 }
 0x1e2   :  { %v2593_v9 = vmul.f32 0.00390625, %v2899_v21  ;;  %vm2293_vm2 = vcmp.lt.f32.partialorder %v2053_v16, 16.0  ;;  %v2066_v26 = vsub.f32 %v1666_v13, %v1986_v17  ;;  %v1732_v30 = vadd.f32 0.5, %v1652_v25  ;;  %vm5118_vm3 = vmand %vm1392_vm15, %vm1472_vm5 }
 0x1e3   :  { %vm2373_vm4 = vmand %vm2213_vm11, %vm2293_vm2  ;;  %v1792_v29 = vmul.f32 0.055555556, %v1712_v22  ;;  %v5109_v32 = vsub.s32 %v1228_v15, %v3331_v14  ;;  %vm1492_vm13 = vcmp.lt.s32.totalorder %v5066_v28, 324  ;;  %v1248_v7 = vadd.s32 424, %v3328_v11 }
 0x1e4   :  { %2690 = vmatpush.msra.mxu3 %v2593_v9  ;;  %v2919_v31 = vsel %vm2373_vm4, 1.0, %v3126_v53  ;;  %vm2306_vm8 = vcmp.lt.f32.partialorder %v2066_v26, 16.0  ;;  %v1812_v35 = vmul.f32 0.055555556, %v1732_v30  ;;  %v1665_v36 = vcvt.s32.f32 %v5100_v27  ;;  %vm5133_vm11 = vmand %vm1412_vm9, %vm1492_vm13 }
 0x1e5   :  { %v2613_v24 = vmul.f32 0.00390625, %v2919_v31  ;;  %vm2386_vm7 = vmand %vm2226_vm14, %vm2306_vm8  ;;  %v1872_v34 = vfloor.f32 %v1792_v29  ;;  %vm1425_vm6 = vcmp.ge.s32.totalorder %v5100_v27, 0  ;;  %vm1505_vm12 = vcmp.lt.s32.totalorder %v5100_v27, 324 }
 0x1e6   :  { %v2932_v37 = vsel %vm2386_vm7, 1.0, %v3126_v53  ;;  %v1631_v40 = vcvt.s32.f32 %v5109_v32  ;;  %v1892_v44 = vfloor.f32 %v1812_v35  ;;  %v1745_v47 = vadd.f32 0.5, %v1665_v36  ;;  %vm5154_vm15 = vmand %vm1425_vm6, %vm1505_vm12 }
 0x1e7   :  { %2706 = vmatpush.msrb.mxu0 %v2613_v24  ;;  %v2626_v41 = vmul.f32 0.00390625, %v2932_v37  ;;  %v1952_v42 = vmul.f32 18.0, %v1872_v34  ;;  %vm5125_vm0 = vcmp.lt.f32.partialorder %v1872_v34, 16.0  ;;  %v5138_v12 = vsub.s32 %v1248_v7, %v3331_v14 }
 0x1e8   :  { %v1711_v48 = vadd.f32 0.5, %v1631_v40  ;;  %v1261_v61 = vadd.s32 528, %v3328_v11  ;;  %vm2192_vm1 = vmand %vm5118_vm3, %vm5125_vm0  ;;  %v1972_v49 = vmul.f32 18.0, %v1892_v44  ;;  %vm5145_vm10 = vcmp.lt.f32.partialorder %v1892_v44, 16.0 }
 0x1e9   :  { %2729 = vmatpush.msra.mxu1 %v2626_v41  ;;  %v2032_v13 = vsub.f32 %v1632_v8, %v1952_v42  ;;  %v1227_v51 = vadd.s32 256, %v3328_v11  ;;  %v1825_v23 = vmul.f32 0.055555556, %v1745_v47  ;;  %vm1391_vm5 = vcmp.ge.s32.totalorder %v5109_v32, 0  ;;  %vm2212_vm4 = vmand %vm5133_vm11, %vm5145_vm10  ;;  %v1172_v47 = vpop.f32.mrf.mxu0 }
 0x1ea   :  { %vm1471_vm2 = vcmp.lt.s32.totalorder %v5109_v32, 324  ;;  %v1791_v56 = vmul.f32 0.055555556, %v1711_v48  ;;  %v2052_v58 = vsub.f32 %v1652_v25, %v1972_v49  ;;  %vm1411_vm9 = vcmp.ge.s32.totalorder %v5138_v12, 0 }
 0x1eb   :  { %vm2272_vm14 = vcmp.lt.f32.partialorder %v2032_v13, 16.0  ;;  %v1651_v2 = vcvt.s32.f32 %v5138_v12  ;;  %v1905_v59 = vfloor.f32 %v1825_v23  ;;  %v5167_v52 = vsub.s32 %v1261_v61, %v3331_v14  ;;  %vm5175_vm7 = vmand %vm1391_vm5, %vm1471_vm2 }
 0x1ec   :  { %vm2352_vm8 = vmand %vm2192_vm1, %vm2272_vm14  ;;  %v1871_v62 = vfloor.f32 %v1791_v56  ;;  %v5170_v63 = vsub.s32 %v1227_v51, %v3331_v14  ;;  %vm2292_vm13 = vcmp.lt.f32.partialorder %v2052_v58, 16.0  ;;  %v1247_v38 = vadd.s32 416, %v3328_v11 }
 0x1ed   :  { %v2898_v0 = vsel %vm2352_vm8, 1.0, %v3126_v53  ;;  %v1731_v60 = vadd.f32 0.5, %v1651_v2  ;;  %vm2372_vm3 = vmand %vm2212_vm4, %vm2292_vm13  ;;  %v1985_v28 = vmul.f32 18.0, %v1905_v59  ;;  %vm5180_vm6 = vcmp.lt.f32.partialorder %v1905_v59, 16.0 }
 0x1ee   :  { %v2592_v3 = vmul.f32 0.00390625, %v2898_v0  ;;  %v1951_v4 = vmul.f32 18.0, %v1871_v62  ;;  %v2918_v20 = vsel %vm2372_vm3, 1.0, %v3126_v53  ;;  %vm5185_vm12 = vcmp.lt.f32.partialorder %v1871_v62, 16.0  ;;  %vm2225_vm11 = vmand %vm5154_vm15, %vm5180_vm6 }
 0x1ef   :  { %vm1491_vm0 = vcmp.lt.s32.totalorder %v5138_v12, 324  ;;  %v1811_v6 = vmul.f32 0.055555556, %v1731_v60  ;;  %v2612_v8 = vmul.f32 0.00390625, %v2918_v20  ;;  %v2065_v15 = vsub.f32 %v1665_v36, %v1985_v28  ;;  %vm2191_vm1 = vmand %vm5175_vm7, %vm5185_vm12 }
 0x1f0   :  { %2691 = vmatpush.msra.mxu3 %v2592_v3  ;;  %v2031_v16 = vsub.f32 %v1631_v40, %v1951_v4  ;;  %v1664_v17 = vcvt.s32.f32 %v5167_v52  ;;  %vm1424_vm10 = vcmp.ge.s32.totalorder %v5167_v52, 0  ;;  %vm1504_vm5 = vcmp.lt.s32.totalorder %v5167_v52, 324  ;;  %vm5206_vm15 = vmand %vm1411_vm9, %vm1491_vm0 }
 0x1f1   :  { %v1891_v19 = vfloor.f32 %v1811_v6  ;;  %v1630_v21 = vcvt.s32.f32 %v5170_v63  ;;  %2707 = vmatpush.msrb.mxu0 %v2612_v8  ;;  %vm2305_vm2 = vcmp.lt.f32.partialorder %v2065_v15, 16.0  ;;  %v5211_v9 = vsub.s32 %v1247_v38, %v3331_v14  ;;  %vm5235_vm7 = vmand %vm1424_vm10, %vm1504_vm5 }
 0x1f2   :  { %vm2271_vm14 = vcmp.lt.f32.partialorder %v2031_v16, 16.0  ;;  %v1744_v25 = vadd.f32 0.5, %v1664_v17  ;;  %vm2385_vm4 = vmand %vm2225_vm11, %vm2305_vm2  ;;  %v1260_v30 = vadd.s32 520, %v3328_v11  ;;  %vm1390_vm13 = vcmp.ge.s32.totalorder %v5170_v63, 0 }
 0x1f3   :  { %v1971_v26 = vmul.f32 18.0, %v1891_v19  ;;  %vm5213_vm8 = vcmp.lt.f32.partialorder %v1891_v19, 16.0  ;;  %v1710_v29 = vadd.f32 0.5, %v1630_v21  ;;  %v2931_v32 = vsel %vm2385_vm4, 1.0, %v3126_v53  ;;  %vm2351_vm9 = vmand %vm2191_vm1, %vm2271_vm14 }
 0x1f4   :  { %v1824_v31 = vmul.f32 0.055555556, %v1744_v25  ;;  %vm1470_vm3 = vcmp.lt.s32.totalorder %v5170_v63, 324  ;;  %v2625_v7 = vmul.f32 0.00390625, %v2931_v32  ;;  %v2897_v24 = vsel %vm2351_vm9, 1.0, %v3126_v53  ;;  %vm2211_vm6 = vmand %vm5206_vm15, %vm5213_vm8 }
 0x1f5   :  { %v2051_v34 = vsub.f32 %v1651_v2, %v1971_v26  ;;  %v1790_v35 = vmul.f32 0.055555556, %v1710_v29  ;;  %v2591_v36 = vmul.f32 0.00390625, %v2897_v24  ;;  %v1650_v40 = vcvt.s32.f32 %v5211_v9  ;;  %vm5246_vm0 = vmand %vm1390_vm13, %vm1470_vm3 }
 0x1f6   :  { %v1904_v39 = vfloor.f32 %v1824_v31  ;;  %v5241_v41 = vsub.s32 %v1260_v30, %v3331_v14  ;;  %v1191_v42 = vmax.f32 %v5082_v10, 0.0  ;;  %2730 = vmatpush.msra.mxu1 %v2625_v7  ;;  %v1246_v45 = vadd.s32 408, %v3328_v11 }
 0x1f7   :  { %vm2291_vm12 = vcmp.lt.f32.partialorder %v2051_v34, 16.0  ;;  %v1870_v44 = vfloor.f32 %v1790_v35  ;;  %2692 = vmatpush.msra.mxu3 %v2591_v36  ;;  %vm1410_vm10 = vcmp.ge.s32.totalorder %v5211_v9, 0  ;;  %v1730_v61 = vadd.f32 0.5, %v1650_v40 }
 0x1f8   :  { %vm2371_vm11 = vmand %vm2211_vm6, %vm2291_vm12  ;;  %v1984_v48 = vmul.f32 18.0, %v1904_v39  ;;  %vm5256_vm1 = vcmp.lt.f32.partialorder %v1904_v39, 16.0  ;;  %vm1490_vm2 = vcmp.lt.s32.totalorder %v5211_v9, 324  ;;  %v1663_v56 = vcvt.s32.f32 %v5241_v41 }
 0x1f9   :  { %v2917_v13 = vsel %vm2371_vm11, 1.0, %v3126_v53  ;;  %v1950_v49 = vmul.f32 18.0, %v1870_v44  ;;  %vm5262_vm5 = vcmp.lt.f32.partialorder %v1870_v44, 16.0  ;;  %vm2224_vm14 = vmand %vm5235_vm7, %vm5256_vm1  ;;  %v1810_v23 = vmul.f32 0.055555556, %v1730_v61 }
 0x1fa   :  { %v2611_v51 = vmul.f32 0.00390625, %v2917_v13  ;;  %v2064_v33 = vsub.f32 %v1664_v17, %v1984_v48  ;;  %v5273_v58 = vadd.f32 %v1172_v47, %v5058_v57  ;;  %vm2190_vm15 = vmand %vm5246_vm0, %vm5262_vm5  ;;  %v5280_v59 = vsub.s32 %v1246_v45, %v3331_v14 }
 0x1fb   :  { %v2030_v2 = vsub.f32 %v1630_v21, %v1950_v49  ;;  %v1259_v62 = vadd.s32 512, %v3328_v11  ;;  %vm5285_vm8 = vmand %vm1410_vm10, %vm1490_vm2  ;;  %v1890_v57 = vfloor.f32 %v1810_v23  ;;  %v1743_v63 = vadd.f32 0.5, %v1663_v56 }
 0x1fc   :  { %2708 = vmatpush.msrb.mxu0 %v2611_v51  ;;  %vm2304_vm4 = vcmp.lt.f32.partialorder %v2064_v33, 16.0  ;;  %v1245_v0 = vadd.s32 400, %v3328_v11  ;;  %vm1423_vm3 = vcmp.ge.s32.totalorder %v5241_v41, 0  ;;  %vm1503_vm6 = vcmp.lt.s32.totalorder %v5241_v41, 324 }
 0x1fd   :  { %vm2384_vm9 = vmand %vm2224_vm14, %vm2304_vm4  ;;  %vm2270_vm13 = vcmp.lt.f32.partialorder %v2030_v2, 16.0  ;;  %vm1409_vm7 = vcmp.ge.s32.totalorder %v5280_v59, 0  ;;  %v1970_v60 = vmul.f32 18.0, %v1890_v57  ;;  %vm5299_vm11 = vcmp.lt.f32.partialorder %v1890_v57, 16.0  ;;  %v1152_v2 = vpop.f32.mrf.mxu3 }
 0x1fe   :  { %v2930_v1 = vsel %vm2384_vm9, 1.0, %v3126_v53  ;;  %vm2350_vm12 = vmand %vm2190_vm15, %vm2270_vm13  ;;  %v1823_v3 = vmul.f32 0.055555556, %v1743_v63  ;;  %v1649_v4 = vcvt.s32.f32 %v5280_v59  ;;  %v1342_v20 = vsub.s32 %v1259_v62, %v3331_v14 }
 0x1ff   :  { %v2624_v28 = vmul.f32 0.00390625, %v2930_v1  ;;  %v2896_v54 = vsel %vm2350_vm12, 1.0, %v3126_v53  ;;  %v2050_v6 = vsub.f32 %v1650_v40, %v1970_v60  ;;  %vm2210_vm0 = vmand %vm5285_vm8, %vm5299_vm11  ;;  %v5311_v15 = vsub.s32 %v1245_v0, %v3331_v14 }
 0x200   :  { %v2590_v5 = vmul.f32 0.00390625, %v2896_v54  ;;  %v1903_v8 = vfloor.f32 %v1823_v3  ;;  %vm5317_vm1 = vmand %vm1423_vm3, %vm1503_vm6  ;;  %vm1489_vm10 = vcmp.lt.s32.totalorder %v5280_v59, 324  ;;  %v1729_v17 = vadd.f32 0.5, %v1649_v4 }
 0x201   :  { %2731 = vmatpush.msra.mxu1 %v2624_v28  ;;  %vm1422_vm5 = vcmp.ge.s32.totalorder %v1342_v20, 0  ;;  %v1662_v19 = vcvt.s32.f32 %v1342_v20  ;;  %vm2290_vm2 = vcmp.lt.f32.partialorder %v2050_v6, 16.0  ;;  %vm1502_vm15 = vcmp.lt.s32.totalorder %v1342_v20, 324  ;;  %vm5341_vm3 = vmand %vm1409_vm7, %vm1489_vm10 }
 0x202   :  { %2693 = vmatpush.msra.mxu3 %v2590_v5  ;;  %v1983_v21 = vmul.f32 18.0, %v1903_v8  ;;  %vm5322_vm14 = vcmp.lt.f32.partialorder %v1903_v8, 16.0  ;;  %vm2370_vm4 = vmand %vm2210_vm0, %vm2290_vm2  ;;  %v1809_v25 = vmul.f32 0.055555556, %v1729_v17  ;;  %vm1408_vm8 = vcmp.ge.s32.totalorder %v5311_v15, 0 }
 0x203   :  { %2694 = vmatmul.f32.vlgmr.msra.gmra.mxu3 %v1191_v42  ;;  %v1742_v9 = vadd.f32 0.5, %v1662_v19  ;;  %v1648_v26 = vcvt.s32.f32 %v5311_v15  ;;  %v2916_v27 = vsel %vm2370_vm4, 1.0, %v3126_v53  ;;  %vm2223_vm9 = vmand %vm5317_vm1, %vm5322_vm14  ;;  %v1244_v30 = vadd.s32 392, %v3328_v11 }
 0x204   :  { %v2063_v29 = vsub.f32 %v1663_v56, %v1983_v21  ;;  %v1243_v32 = vadd.s32 384, %v3328_v11  ;;  %v2610_v10 = vmul.f32 0.00390625, %v2916_v27  ;;  %v1889_v31 = vfloor.f32 %v1809_v25  ;;  %vm5357_vm7 = vmand %vm1422_vm5, %vm1502_vm15  ;;  %v3082_v25 = vld [vmem:[%s5444_s1] sm:$0xff]  ;;  %s3129_s1 = smov [#allocation2]  }
 0x205   :  { %v1822_v7 = vmul.f32 0.055555556, %v1742_v9  ;;  %v1728_v24 = vadd.f32 0.5, %v1648_v26  ;;  %vm1488_vm6 = vcmp.lt.s32.totalorder %v5311_v15, 324  ;;  %v1327_v35 = vsub.s32 %v1244_v30, %v3331_v14  ;;  %2771 = vrot.lane.b32.xlu1 %v3082_v25, %s3127_s12  ;;  %s2808_s14 = sshll.u32 %s3129_s1, 4  ;;  %s2809_s14 = int_to_ptr.vmem [resolvable:$true] %s2808_s14 }
 0x206   :  { %vm2303_vm13 = vcmp.lt.f32.partialorder %v2063_v29, 16.0  ;;  %v5348_v36 = vsub.s32 %v1243_v32, %v3331_v14  ;;  %2709 = vmatpush.msrb.mxu0 %v2610_v10  ;;  %v1969_v11 = vmul.f32 18.0, %v1889_v31  ;;  %vm5350_vm11 = vcmp.lt.f32.partialorder %v1889_v31, 16.0  ;;  %vm5375_vm10 = vmand %vm1408_vm8, %vm1488_vm6 }
 0x207   :  { %vm2383_vm12 = vmand %vm2223_vm9, %vm2303_vm13  ;;  %v1902_v39 = vfloor.f32 %v1822_v7  ;;  %v1808_v40 = vmul.f32 0.055555556, %v1728_v24  ;;  %v1647_v43 = vcvt.s32.f32 %v1327_v35  ;;  %v1188_v48 = vadd.f32 %v4503_v18, %v5273_v58 }
 0x208   :  { %v2929_v41 = vsel %vm2383_vm12, 1.0, %v3126_v53  ;;  %v2049_v44 = vsub.f32 %v1649_v4, %v1969_v11  ;;  %vm2209_vm0 = vmand %vm5341_vm3, %vm5350_vm11  ;;  %vm1407_vm5 = vcmp.ge.s32.totalorder %v1327_v35, 0  ;;  %vm1487_vm15 = vcmp.lt.s32.totalorder %v1327_v35, 324 }
 0x209   :  { %v2623_v14 = vmul.f32 0.00390625, %v2929_v41  ;;  %v1982_v45 = vmul.f32 18.0, %v1902_v39  ;;  %vm5365_vm1 = vcmp.lt.f32.partialorder %v1902_v39, 16.0  ;;  %v1888_v61 = vfloor.f32 %v1808_v40  ;;  %vm5405_vm11 = vmand %vm1407_vm5, %vm1487_vm15 }
 0x20a   :  { %v1727_v13 = vadd.f32 0.5, %v1647_v43  ;;  %vm2289_vm2 = vcmp.lt.f32.partialorder %v2049_v44, 16.0  ;;  %vm2222_vm14 = vmand %vm5357_vm7, %vm5365_vm1  ;;  %v1646_v50 = vcvt.s32.f32 %v5348_v36  ;;  %vm1406_vm9 = vcmp.ge.s32.totalorder %v5348_v36, 0 }
 0x20b   :  { %2732 = vmatpush.msra.mxu1 %v2623_v14  ;;  %v2062_v49 = vsub.f32 %v1662_v19, %v1982_v45  ;;  %vm2369_vm4 = vmand %vm2209_vm0, %vm2289_vm2  ;;  %v1968_v51 = vmul.f32 18.0, %v1888_v61  ;;  %vm5384_vm8 = vcmp.lt.f32.partialorder %v1888_v61, 16.0  ;;  %vm1486_vm6 = vcmp.lt.s32.totalorder %v5348_v36, 324 }
 0x20c   :  { %v1807_v23 = vmul.f32 0.055555556, %v1727_v13  ;;  %v2915_v56 = vsel %vm2369_vm4, 1.0, %v3126_v53  ;;  %vm2208_vm3 = vmand %vm5375_vm10, %vm5384_vm8  ;;  %v1726_v58 = vadd.f32 0.5, %v1646_v50  ;;  %v1046_v57 = vadd.f32 %v4914_v55, %v3832_v46 }
 0x20d   :  { %vm2302_vm13 = vcmp.lt.f32.partialorder %v2062_v49, 16.0  ;;  %v2609_v59 = vmul.f32 0.00390625, %v2915_v56  ;;  %v2048_v62 = vsub.f32 %v1648_v26, %v1968_v51  ;;  %v1193_v63 = vmax.f32 %v1188_v48, 0.0  ;;  %vm5417_vm1 = vmand %vm1406_vm9, %vm1486_vm6 }
 0x20e   :  { %vm2382_vm12 = vmand %vm2222_vm14, %vm2302_vm13  ;;  %v1887_v52 = vfloor.f32 %v1807_v23  ;;  %v1806_v60 = vmul.f32 0.055555556, %v1726_v58  ;;  %v1178_v55 = vadd.f32 %v1152_v2, %v1046_v57  ;;  %v2738_v7 = vperm.slane %v3082_v25, 0 }
 0x20f   :  { %v2928_v0 = vsel %vm2382_vm12, 1.0, %v3126_v53  ;;  %2710 = vmatpush.msrb.mxu0 %v2609_v59  ;;  %vm2288_vm0 = vcmp.lt.f32.partialorder %v2048_v62, 16.0  ;;  %vm5757_vm13 = vcmask 64512  }
 0x210   :  { %v2622_v38 = vmul.f32 0.00390625, %v2928_v0  ;;  %v1967_v3 = vmul.f32 18.0, %v1887_v52  ;;  %vm5409_vm7 = vcmp.lt.f32.partialorder %v1887_v52, 16.0  ;;  %vm2368_vm5 = vmand %vm2208_vm3, %vm2288_vm0  ;;  %v1886_v54 = vfloor.f32 %v1806_v60  ;;  %2775 = vrot.lane.b32.xlu1 %v2738_v7, %s3128_s13 }
 0x211   :  { %v2914_v4 = vsel %vm2368_vm5, 1.0, %v3126_v53  ;;  %vm2207_vm2 = vmand %vm5405_vm11, %vm5409_vm7  ;;  %v1187_v8 = vadd.f32 %v4503_v18, %v1178_v55  ;;  %vm2801_vm3 = vcmask 33792  }
 0x212   :  { %2733 = vmatpush.msra.mxu1 %v2622_v38  ;;  %v2047_v20 = vsub.f32 %v1647_v43, %v1967_v3  ;;  %v2608_v5 = vmul.f32 0.00390625, %v2914_v4  ;;  %v1966_v6 = vmul.f32 18.0, %v1886_v54  ;;  %vm2126_vm14 = vcmp.lt.f32.partialorder %v1886_v54, 16.0 }
 0x213   :  { %2734 = vmatmul.f32.vlgmr.msra.gmra.mxu1 %v1193_v63  ;;  %vm2206_vm4 = vmand %vm5417_vm1, %vm2126_vm14  ;;  %v1192_v19 = vmax.f32 %v1187_v8, 0.0 }
 0x214   :  { %vm2287_vm15 = vcmp.lt.f32.partialorder %v2047_v20, 16.0  ;;  %2711 = vmatpush.msrb.mxu0 %v2608_v5  ;;  %v2046_v15 = vsub.f32 %v1646_v50, %v1966_v6 }
 0x215   :  { %vm2367_vm10 = vmand %vm2207_vm2, %vm2287_vm15 }
 0x216   :  { %v2913_v16 = vsel %vm2367_vm10, 1.0, %v3126_v53  ;;  %vm2286_vm8 = vcmp.lt.f32.partialorder %v2046_v15, 16.0 }
 0x217   :  { %v2607_v17 = vmul.f32 0.00390625, %v2913_v16  ;;  %vm2366_vm9 = vmand %vm2206_vm4, %vm2286_vm8 }
 0x218   :  { %v2912_v21 = vsel %vm2366_vm9, 1.0, %v3126_v53 }
 0x219   :  { %2712 = vmatpush.msrb.mxu0 %v2607_v17  ;;  %v2606_v22 = vmul.f32 0.00390625, %v2912_v21 }
 0x21b   :  { %2713 = vmatpush.msrb.mxu0 %v2606_v22 }
 0x21c   :  { %2714 = vmatmul.f32.vlgmr.msrb.gmra.mxu0 %v1192_v19 }
 0x22d   :  { %v2655_v18 = vpop.f32.mrf.mxu1 }
 0x245   :  { %v2675_v9 = vpop.f32.mrf.mxu2 }
 0x246   :  { %v2676_v29 = vadd.f32 %v2675_v9, %v2655_v18 }
 0x277   :  { %v2772_v26 = vpop.permute.xlu1 %2771 }
 0x278   :  { %2796 = vmatpush.msra.mxu2 %v2772_v26 }
 0x282   :  { %v2776_v34 = vpop.permute.xlu1 %2775 }
 0x286   :  { %v2695_v27 = vpop.f32.mrf.mxu3 }
 0x287   :  { %v2696_v30 = vadd.f32 %v2695_v27, %v2676_v29 }
 0x290   :  { %v2735_v31 = vpop.f32.mrf.mxu1 }
 0x299   :  { %v2715_v32 = vpop.f32.mrf.mxu0 }
 0x29a   :  { %v2716_v10 = vadd.f32 %v2715_v32, %v2696_v30 }
 0x29c   :  { %v2736_v53 = vadd.f32 %v2735_v31, %v2716_v10 }
 0x29e   :  { %2739 = vxpose.xlu2.b32.start.end [1/1] (short) (narrow) %v2736_v53, 8 }
 0x337   :  { %v2755_v24 = vpop.trf.xlu2 }
 0x338   :  { %2944 = vmatmul.msk.f32.vlgmr.msra.gmra.mxu2 %vm5757_vm13, %v2755_v24 }
 0x3bb   :  { %v2798_v35 = vpop.f32.mrf.mxu2 }
 0x3bc   :  { %v2799_v36 = vadd.f32 %v2798_v35, %v2776_v34 }
 0x3be   :  { %2802 = vst.msk [vmem:[#allocation2] sm:$0x3] %vm2801_vm3, %v2799_v36 }
 0x3bf   :  { %2813 = dma.vmem_to_hbm [thread:$0]  %s2809_s14, 32, %s2811_s17, [#allocation3]  }
 0x3c0   :  { %3107 = dma.done.wait [#allocation3], 32  }
 0x3c1   :  { %3108 = vsyncadd [#allocation3], 4294967264 }
 0x3c2   :  { %2818 = vsyncpa [#allocation3], 1 }

</bundles_post_ra>
